<compile_context>
chip_gen: v7x
topology: tpu7x:2x2x1
jax: 0.10.0
libtpu: 0.0.40
codegen_flags: <defaults>
</compile_context>

<pallas_src>
import functools

import jax
import jax.numpy as jnp
from jax.experimental import pallas as pl
from jax.experimental.pallas import tpu as pltpu


_ROW_TARGET = 256          # target rows per inner matmul (vreg-resident f32 acc)


# ------------------------------ Pallas kernel -------------------------------

def _halo_conv_kernel(x_ref, w_ref, b_ref, o_ref, xs_ref, *,
                      KH, KW, PH, PW, H_BLK, fold_kw):
    """Generic stencil conv.

    x_ref : (tile_n, H, W, Cin)          unpadded input block (bf16/f32)
    w_ref : (KH*KW, Cin, Cout)           tap-major weights, or
            (KH, KW*Cin, Cout)           when fold_kw
    b_ref : (1, Cout)                    bias (f32)
    o_ref : (tile_n, Ho, Wo, Cout)       output block
    xs_ref: (KW, tile_n, Hp, Wo, Cin)    VMEM scratch (column-shifted copies),
            or (tile_n, Hp, Wo, KW*Cin)  when fold_kw
    """
    tile_n, Ho, Wo, Cout = o_ref.shape
    H, W, Cin = x_ref.shape[1], x_ref.shape[2], x_ref.shape[3]

    # --- 1. build the zero-padded, column-shifted input copies in VMEM ------
    # (replaces the HBM jnp.pad pass; KW materialized copies instead of KH*KW)
    if fold_kw:
        xs_ref[...] = jnp.zeros(xs_ref.shape, xs_ref.dtype)
    for j in range(KW):
        xlo = max(0, PW - j)
        xhi = min(Wo, W + PW - j)
        if not fold_kw:
            xs_ref[j] = jnp.zeros(xs_ref.shape[1:], xs_ref.dtype)
        if xhi > xlo:
            src = x_ref[:, :, xlo + j - PW:xhi + j - PW, :]
            if fold_kw:
                xs_ref[:, PH:PH + H, xlo:xhi, j * Cin:(j + 1) * Cin] = src
            else:
                xs_ref[j, :, PH:PH + H, xlo:xhi, :] = src

    # --- 2. tap-accumulate per row sub-block --------------------------------
    n_taps = KH if fold_kw else KH * KW
    w_taps = [w_ref[k] for k in range(n_taps)]          # hoisted VMEM loads
    bias = b_ref[...].astype(jnp.float32)               # (1, Cout)
    Kd = KW * Cin if fold_kw else Cin

    nh = (Ho + H_BLK - 1) // H_BLK
    for hb in range(nh):                                # static (unrolled)
        h0 = hb * H_BLK
        hlen = min(H_BLK, Ho - h0)
        rows = tile_n * hlen * Wo
        acc = jnp.zeros((rows, Cout), jnp.float32)
        for i in range(KH):
            if fold_kw:
                tap = xs_ref[:, h0 + i:h0 + i + hlen, :, :].reshape(rows, Kd)
                acc = acc + jnp.dot(tap, w_taps[i],
                                    preferred_element_type=jnp.float32)
            else:
                for j in range(KW):
                    tap = xs_ref[j, :, h0 + i:h0 + i + hlen, :, :]
                    tap = tap.reshape(rows, Kd)
                    acc = acc + jnp.dot(tap, w_taps[i * KW + j],
                                        preferred_element_type=jnp.float32)
        acc = acc + bias
        o_ref[:, h0:h0 + hlen, :, :] = (
            acc.reshape(tile_n, hlen, Wo, Cout).astype(o_ref.dtype))


# ------------------------------ tiling helpers -------------------------------

def _vmem_capacity_bytes():
    try:
        cap = getattr(pltpu.get_tpu_info(), "vmem_capacity_bytes", None)
        if cap:
            return int(cap)
    except Exception:
        pass
    return 128 * 1024 * 1024


def _pick_tile(n, bytes_per_unit, budget_bytes, *, align=1, other_steps=1,
               min_total_steps=4, max_tile=None):
    """Tile along an axis of length n: as big as the VMEM budget allows,
    multiple of `align` (or the full axis), preferring >= min_total_steps total
    grid steps (counting `other_steps` steps from the other grid axes)."""
    max_tile = n if max_tile is None else max(1, min(max_tile, n))
    by_budget = max(1, budget_bytes // max(1, bytes_per_unit))
    need = -(-min_total_steps // max(1, other_steps))
    by_steps = n if need <= 1 else max(1, n // need)
    t = max(1, min(max_tile, by_budget, by_steps))
    if t >= n:
        return n
    return min(n, max(align, (t // align) * align))


# ------------------------------ conv driver ----------------------------------

def _halo_conv(x, w4, b, *, KH, KW, PH, PW, out_dtype):
    """x: (N, H, W, Cin) channels-last; w4: (KH, KW, Cin, Cout); b: (Cout,)."""
    N, H, W, Cin = x.shape
    Cout = w4.shape[-1]
    Ho = H + 2 * PH - (KH - 1)
    Wo = W + 2 * PW - (KW - 1)
    Hp = H + 2 * PH
    cbytes = x.dtype.itemsize
    obytes = jnp.dtype(out_dtype).itemsize

    # Fold the KW taps into one contraction only when the lane concat is
    # 128-aligned (real model widths); toy Cin takes the per-tap path.
    fold_kw = (KW > 1) and (Cin % 128 == 0) and (Cin <= 128)
    # Halo-free W tiling is only possible for the temporal (KW == 1) conv.
    can_tile_w = (KW == 1 and PW == 0)

    cap = _vmem_capacity_bytes()
    vmem_limit = min((cap * 3) // 4, 112 * 1024 * 1024)
    budget = cap // 3

    w_bytes = KH * KW * Cin * Cout * cbytes
    fixed = 2 * w_bytes + 2 * Cout * 4 + 2 * _ROW_TARGET * Cout * 4 + (1 << 20)
    budget_tiled = max(1 << 18, budget - fixed)

    if can_tile_w:
        per_w = (2 * H * Cin * cbytes + 2 * Ho * Cout * obytes
                 + KW * Hp * Cin * cbytes)
        tile_w = _pick_tile(W, per_w, budget_tiled, align=8,
                            other_steps=max(1, N), min_total_steps=4,
                            max_tile=_ROW_TARGET)
    else:
        tile_w = W
    w_in_blk = tile_w
    w_out_blk = tile_w if can_tile_w else Wo
    n_w_steps = pl.cdiv(W, tile_w) if can_tile_w else 1

    per_n = (2 * H * w_in_blk * Cin * cbytes
             + 2 * Ho * w_out_blk * Cout * obytes
             + KW * Hp * w_out_blk * Cin * cbytes)
    tile_n = _pick_tile(N, per_n, budget_tiled, align=1, other_steps=n_w_steps,
                        min_total_steps=4,
                        max_tile=max(1, _ROW_TARGET // max(1, w_out_blk)))

    h_blk = max(1, min(Ho, _ROW_TARGET // max(1, tile_n * w_out_blk)))
    grid = (pl.cdiv(N, tile_n), n_w_steps)

    if fold_kw:
        wk = w4.reshape(KH, KW * Cin, Cout)
        w_block = (KH, KW * Cin, Cout)
        xs_shape = (tile_n, Hp, w_out_blk, KW * Cin)
    else:
        wk = w4.reshape(KH * KW, Cin, Cout)
        w_block = (KH * KW, Cin, Cout)
        xs_shape = (KW, tile_n, Hp, w_out_blk, Cin)
    b2 = b.reshape(1, Cout).astype(jnp.float32)

    kernel = functools.partial(_halo_conv_kernel, KH=KH, KW=KW, PH=PH, PW=PW,
                               H_BLK=h_blk, fold_kw=fold_kw)
    return pl.pallas_call(
        kernel,
        out_shape=jax.ShapeDtypeStruct((N, Ho, Wo, Cout), out_dtype),
        grid=grid,
        in_specs=[
            pl.BlockSpec((tile_n, H, w_in_blk, Cin), lambda n, wt: (n, 0, wt, 0)),
            # NOTE: weight/bias index_maps are constant; pl.Buffered(1) here
            # would drop their second VMEM buffer (see TODO above).
            pl.BlockSpec(w_block, lambda n, wt: (0, 0, 0)),
            pl.BlockSpec((1, Cout), lambda n, wt: (0, 0)),
        ],
        out_specs=pl.BlockSpec((tile_n, Ho, w_out_blk, Cout),
                               lambda n, wt: (n, 0, wt, 0)),
        scratch_shapes=[pltpu.VMEM(xs_shape, x.dtype)],
        compiler_params=pltpu.CompilerParams(
            dimension_semantics=("parallel", "parallel"),
            vmem_limit_bytes=int(vmem_limit)),
    )(x, wk, b2)


# --------------------------- conv wrappers (glue) ----------------------------

def spatial_conv2d(x_nhwc, w_oihw, b, kernel_size, padding,
                   compute_dtype=jnp.bfloat16, out_dtype=jnp.float32):
    """Conv2d (stride 1) via the halo kernel.  x_nhwc: (N, H, W, Cin)."""
    del kernel_size  # taken from the weight shape
    KH, KW = w_oihw.shape[2], w_oihw.shape[3]
    w4 = jnp.transpose(w_oihw, (2, 3, 1, 0)).astype(compute_dtype)  # (KH,KW,Ci,Co)
    return _halo_conv(x_nhwc.astype(compute_dtype), w4, b,
                      KH=KH, KW=KW, PH=padding, PW=padding, out_dtype=out_dtype)


def temporal_conv1d(y_bfpc, w_oik, b, compute_dtype=jnp.bfloat16,
                    out_dtype=jnp.float32):
    """Conv1d over frames (kernel 3, pad 1) == (3 x 1) stencil over (F, P).
    y_bfpc: (B, F, P, C).  The frame halo is built in-kernel (no HBM pad)."""
    Cout, Cin, K = w_oik.shape
    w4 = jnp.transpose(w_oik, (2, 1, 0)).reshape(K, 1, Cin, Cout)
    return _halo_conv(y_bfpc.astype(compute_dtype), w4.astype(compute_dtype), b,
                      KH=K, KW=1, PH=K // 2, PW=0, out_dtype=out_dtype)


# ------------------------------ Pseudo3DConv ---------------------------------

def init_pseudo3d_params(key, dim, dim_out, kernel_size):
    k1, k2 = jax.random.split(key)
    w_spatial = 0.1 * jax.random.normal(
        k1, (dim_out, dim, kernel_size, kernel_size), jnp.float32)
    b_spatial = 0.1 * jax.random.normal(k2, (dim_out,), jnp.float32)
    # temporal conv: nn.init.dirac_ weight (identity tap at k=1), zero bias
    idx = jnp.arange(dim_out)
    w_temporal = jnp.zeros((dim_out, dim_out, 3), jnp.float32)
    w_temporal = w_temporal.at[idx, idx, 1].set(1.0)
    b_temporal = jnp.zeros((dim_out,), jnp.float32)
    return dict(w_s=w_spatial, b_s=b_spatial, w_t=w_temporal, b_t=b_temporal)


def pseudo3d_conv(params, x, kernel_size, padding, convolve_across_time=True,
                  compute_dtype=jnp.bfloat16, out_dtype=jnp.float32):
    """x: (B, C, F, H, W) video or (B, C, H, W) image, PyTorch layout."""
    is_video = x.ndim == 5
    convolve_across_time = convolve_across_time and is_video
    if is_video:
        B, C, F, H, W = x.shape
        x_nhwc = jnp.transpose(x, (0, 2, 3, 4, 1)).reshape(B * F, H, W, C)
    else:
        x_nhwc = jnp.transpose(x, (0, 2, 3, 1))

    # Keep the spatial->temporal intermediate in bf16 only if it is consumed
    # by the temporal conv.
    spatial_out_dtype = compute_dtype if convolve_across_time else out_dtype
    y = spatial_conv2d(x_nhwc, params["w_s"], params["b_s"], kernel_size,
                       padding, compute_dtype, spatial_out_dtype)
    _, Ho, Wo, Cout = y.shape

    if not is_video:
        return jnp.transpose(y, (0, 3, 1, 2))
    y5 = y.reshape(B, F, Ho, Wo, Cout)
    if not convolve_across_time:
        return jnp.transpose(y5, (0, 4, 1, 2, 3))

    z = temporal_conv1d(y5.reshape(B, F, Ho * Wo, Cout), params["w_t"],
                        params["b_t"], compute_dtype, out_dtype)
    z5 = z.reshape(B, F, Ho, Wo, Cout)
    # NOTE: this final NHWC->NCHW transpose is one extra HBM pass kept only for
    # PyTorch-layout parity; a channels-last interface would remove it.
    return jnp.transpose(z5, (0, 4, 1, 2, 3))            # (B, Cout, F, Ho, Wo)


# -------------------------------- reference ----------------------------------

def reference(params, x):
    B, C, F, H, W = x.shape
    x4 = jnp.transpose(x, (0, 2, 1, 3, 4)).reshape(B * F, C, H, W)
    y = jax.lax.conv_general_dilated(
        x4, params["w_s"], window_strides=(1, 1), padding=[(1, 1), (1, 1)],
        dimension_numbers=("NCHW", "OIHW", "NCHW"))
    y = y + params["b_s"][None, :, None, None]
    Cout, Ho, Wo = y.shape[1], y.shape[2], y.shape[3]
    y5 = jnp.transpose(y.reshape(B, F, Cout, Ho, Wo), (0, 2, 1, 3, 4))
    t_in = jnp.transpose(y5, (0, 3, 4, 1, 2)).reshape(B * Ho * Wo, Cout, F)
    t = jax.lax.conv_general_dilated(
        t_in, params["w_t"], window_strides=(1,), padding=[(1, 1)],
        dimension_numbers=("NCH", "OIH", "NCH"))
    t = t + params["b_t"][None, :, None]
    t5 = jnp.transpose(t.reshape(B, Ho, Wo, Cout, F), (0, 3, 4, 1, 2))
    return t5


# ----------------------------------- main -------------------------------------

if __name__ == "__main__":
    B, Cin, Cout, F, H, W = 2, 4, 8, 4, 8, 8
    kernel_size, padding = 3, 1

    key = jax.random.PRNGKey(0)
    kp, kx = jax.random.split(key)
    params = init_pseudo3d_params(kp, Cin, Cout, kernel_size)
    x = jax.random.normal(kx, (B, Cin, F, H, W), jnp.float32)

    fwd = jax.jit(functools.partial(
        pseudo3d_conv, kernel_size=kernel_size, padding=padding,
        convolve_across_time=True))
    out = jax.block_until_ready(fwd(params, x))

    ref = jax.block_until_ready(reference(params, x))
    assert out.shape == (B, Cout, F, H, W), out.shape
    # bf16 activations/weights on the MXU (f32 accumulation) -> loose tolerance.
    assert jnp.allclose(out, ref, atol=3e-2, rtol=3e-2), "mismatch vs reference"

    print("KERNEL_OK")
</pallas_src>

<mosaic_0001>
module attributes {stable_mosaic.version = 11 : i64} {
  func.func @_halo_conv_kernel(%arg0: i32, %arg1: i32, %arg2: memref<2x8x8x4xbf16, #tpu.memory_space<vmem>>, %arg3: memref<9x4x8xbf16, #tpu.memory_space<vmem>>, %arg4: memref<1x8xf32, #tpu.memory_space<vmem>>, %arg5: memref<2x8x8x8xbf16, #tpu.memory_space<vmem>>, %arg6: memref<3x2x10x8x4xbf16, #tpu.memory_space<vmem>>) attributes {dimension_semantics = [#tpu.dimension_semantics<parallel>, #tpu.dimension_semantics<parallel>], iteration_bounds = array<i64: 4, 1>, scalar_prefetch = 0 : i64, scratch_operands = 1 : i64, tpu.core_type = #tpu.core_type<tc>, window_params = [{transform_indices = @transform_0, window_bounds = array<i64: 2, 8, 8, 4>}, {pipeline_mode = #tpu.pipeline_mode<synchronous>, transform_indices = @transform_1, window_bounds = array<i64: 9, 4, 8>}, {pipeline_mode = #tpu.pipeline_mode<synchronous>, transform_indices = @transform_2, window_bounds = array<i64: 1, 8>}, {transform_indices = @transform_3, window_bounds = array<i64: 2, 8, 8, 8>}]} {
    %cst = arith.constant 0.000000e+00 : bf16
    %0 = vector.broadcast %cst : bf16 to vector<2x10x8x4xbf16>
    %c0 = arith.constant 0 : index
    %c0_0 = arith.constant 0 : index
    %c0_1 = arith.constant 0 : index
    %c0_2 = arith.constant 0 : index
    %c0_3 = arith.constant 0 : index
    %1 = vector.load %arg6[%c0, %c0_0, %c0_1, %c0_2, %c0_3] : memref<3x2x10x8x4xbf16, #tpu.memory_space<vmem>>, vector<1x2x10x8x4xbf16>
    %2 = vector.shape_cast %1 : vector<1x2x10x8x4xbf16> to vector<2x10x8x4xbf16>
    %3 = vector.shape_cast %0 : vector<2x10x8x4xbf16> to vector<1x2x10x8x4xbf16>
    tpu.vector_store %arg6[%c0, %c0_0, %c0_1, %c0_2, %c0_3], %3 {strides = array<i32>} : memref<3x2x10x8x4xbf16, #tpu.memory_space<vmem>>, vector<1x2x10x8x4xbf16>,
    %c0_4 = arith.constant 0 : index
    %c0_5 = arith.constant 0 : index
    %c0_6 = arith.constant 0 : index
    %c0_7 = arith.constant 0 : index
    %4 = vector.load %arg2[%c0_4, %c0_5, %c0_6, %c0_7] : memref<2x8x8x4xbf16, #tpu.memory_space<vmem>>, vector<2x8x7x4xbf16>
    %c0_8 = arith.constant 0 : index
    %c0_9 = arith.constant 0 : index
    %c1 = arith.constant 1 : index
    %c1_10 = arith.constant 1 : index
    %c0_11 = arith.constant 0 : index
    %5 = vector.load %arg6[%c0_8, %c0_9, %c1, %c1_10, %c0_11] : memref<3x2x10x8x4xbf16, #tpu.memory_space<vmem>>, vector<1x2x8x7x4xbf16>
    %6 = vector.shape_cast %5 : vector<1x2x8x7x4xbf16> to vector<2x8x7x4xbf16>
    %7 = vector.shape_cast %4 : vector<2x8x7x4xbf16> to vector<1x2x8x7x4xbf16>
    tpu.vector_store %arg6[%c0_8, %c0_9, %c1, %c1_10, %c0_11], %7 {strides = array<i32>} : memref<3x2x10x8x4xbf16, #tpu.memory_space<vmem>>, vector<1x2x8x7x4xbf16>,
    %cst_12 = arith.constant 0.000000e+00 : bf16
    %8 = vector.broadcast %cst_12 : bf16 to vector<2x10x8x4xbf16>
    %c1_13 = arith.constant 1 : index
    %c0_14 = arith.constant 0 : index
    %c0_15 = arith.constant 0 : index
    %c0_16 = arith.constant 0 : index
    %c0_17 = arith.constant 0 : index
    %9 = vector.load %arg6[%c1_13, %c0_14, %c0_15, %c0_16, %c0_17] : memref<3x2x10x8x4xbf16, #tpu.memory_space<vmem>>, vector<1x2x10x8x4xbf16>
    %10 = vector.shape_cast %9 : vector<1x2x10x8x4xbf16> to vector<2x10x8x4xbf16>
    %11 = vector.shape_cast %8 : vector<2x10x8x4xbf16> to vector<1x2x10x8x4xbf16>
    tpu.vector_store %arg6[%c1_13, %c0_14, %c0_15, %c0_16, %c0_17], %11 {strides = array<i32>} : memref<3x2x10x8x4xbf16, #tpu.memory_space<vmem>>, vector<1x2x10x8x4xbf16>,
    %c0_18 = arith.constant 0 : index
    %c0_19 = arith.constant 0 : index
    %c0_20 = arith.constant 0 : index
    %c0_21 = arith.constant 0 : index
    %12 = vector.load %arg2[%c0_18, %c0_19, %c0_20, %c0_21] : memref<2x8x8x4xbf16, #tpu.memory_space<vmem>>, vector<2x8x8x4xbf16>
    %c1_22 = arith.constant 1 : index
    %c0_23 = arith.constant 0 : index
    %c1_24 = arith.constant 1 : index
    %c0_25 = arith.constant 0 : index
    %c0_26 = arith.constant 0 : index
    %13 = vector.load %arg6[%c1_22, %c0_23, %c1_24, %c0_25, %c0_26] : memref<3x2x10x8x4xbf16, #tpu.memory_space<vmem>>, vector<1x2x8x8x4xbf16>
    %14 = vector.shape_cast %13 : vector<1x2x8x8x4xbf16> to vector<2x8x8x4xbf16>
    %15 = vector.shape_cast %12 : vector<2x8x8x4xbf16> to vector<1x2x8x8x4xbf16>
    tpu.vector_store %arg6[%c1_22, %c0_23, %c1_24, %c0_25, %c0_26], %15 {strides = array<i32>} : memref<3x2x10x8x4xbf16, #tpu.memory_space<vmem>>, vector<1x2x8x8x4xbf16>,
    %cst_27 = arith.constant 0.000000e+00 : bf16
    %16 = vector.broadcast %cst_27 : bf16 to vector<2x10x8x4xbf16>
    %c2 = arith.constant 2 : index
    %c0_28 = arith.constant 0 : index
    %c0_29 = arith.constant 0 : index
    %c0_30 = arith.constant 0 : index
    %c0_31 = arith.constant 0 : index
    %17 = vector.load %arg6[%c2, %c0_28, %c0_29, %c0_30, %c0_31] : memref<3x2x10x8x4xbf16, #tpu.memory_space<vmem>>, vector<1x2x10x8x4xbf16>
    %18 = vector.shape_cast %17 : vector<1x2x10x8x4xbf16> to vector<2x10x8x4xbf16>
    %19 = vector.shape_cast %16 : vector<2x10x8x4xbf16> to vector<1x2x10x8x4xbf16>
    tpu.vector_store %arg6[%c2, %c0_28, %c0_29, %c0_30, %c0_31], %19 {strides = array<i32>} : memref<3x2x10x8x4xbf16, #tpu.memory_space<vmem>>, vector<1x2x10x8x4xbf16>,
    %c0_32 = arith.constant 0 : index
    %c0_33 = arith.constant 0 : index
    %c1_34 = arith.constant 1 : index
    %c0_35 = arith.constant 0 : index
    %20 = vector.load %arg2[%c0_32, %c0_33, %c1_34, %c0_35] : memref<2x8x8x4xbf16, #tpu.memory_space<vmem>>, vector<2x8x7x4xbf16>
    %c2_36 = arith.constant 2 : index
    %c0_37 = arith.constant 0 : index
    %c1_38 = arith.constant 1 : index
    %c0_39 = arith.constant 0 : index
    %c0_40 = arith.constant 0 : index
    %21 = vector.load %arg6[%c2_36, %c0_37, %c1_38, %c0_39, %c0_40] : memref<3x2x10x8x4xbf16, #tpu.memory_space<vmem>>, vector<1x2x8x7x4xbf16>
    %22 = vector.shape_cast %21 : vector<1x2x8x7x4xbf16> to vector<2x8x7x4xbf16>
    %23 = vector.shape_cast %20 : vector<2x8x7x4xbf16> to vector<1x2x8x7x4xbf16>
    tpu.vector_store %arg6[%c2_36, %c0_37, %c1_38, %c0_39, %c0_40], %23 {strides = array<i32>} : memref<3x2x10x8x4xbf16, #tpu.memory_space<vmem>>, vector<1x2x8x7x4xbf16>,
    %c0_41 = arith.constant 0 : index
    %c0_42 = arith.constant 0 : index
    %c0_43 = arith.constant 0 : index
    %24 = vector.load %arg3[%c0_41, %c0_42, %c0_43] : memref<9x4x8xbf16, #tpu.memory_space<vmem>>, vector<1x4x8xbf16>
    %25 = vector.shape_cast %24 : vector<1x4x8xbf16> to vector<4x8xbf16>
    %c1_44 = arith.constant 1 : index
    %c0_45 = arith.constant 0 : index
    %c0_46 = arith.constant 0 : index
    %26 = vector.load %arg3[%c1_44, %c0_45, %c0_46] : memref<9x4x8xbf16, #tpu.memory_space<vmem>>, vector<1x4x8xbf16>
    %27 = vector.shape_cast %26 : vector<1x4x8xbf16> to vector<4x8xbf16>
    %c2_47 = arith.constant 2 : index
    %c0_48 = arith.constant 0 : index
    %c0_49 = arith.constant 0 : index
    %28 = vector.load %arg3[%c2_47, %c0_48, %c0_49] : memref<9x4x8xbf16, #tpu.memory_space<vmem>>, vector<1x4x8xbf16>
    %29 = vector.shape_cast %28 : vector<1x4x8xbf16> to vector<4x8xbf16>
    %c3 = arith.constant 3 : index
    %c0_50 = arith.constant 0 : index
    %c0_51 = arith.constant 0 : index
    %30 = vector.load %arg3[%c3, %c0_50, %c0_51] : memref<9x4x8xbf16, #tpu.memory_space<vmem>>, vector<1x4x8xbf16>
    %31 = vector.shape_cast %30 : vector<1x4x8xbf16> to vector<4x8xbf16>
    %c4 = arith.constant 4 : index
    %c0_52 = arith.constant 0 : index
    %c0_53 = arith.constant 0 : index
    %32 = vector.load %arg3[%c4, %c0_52, %c0_53] : memref<9x4x8xbf16, #tpu.memory_space<vmem>>, vector<1x4x8xbf16>
    %33 = vector.shape_cast %32 : vector<1x4x8xbf16> to vector<4x8xbf16>
    %c5 = arith.constant 5 : index
    %c0_54 = arith.constant 0 : index
    %c0_55 = arith.constant 0 : index
    %34 = vector.load %arg3[%c5, %c0_54, %c0_55] : memref<9x4x8xbf16, #tpu.memory_space<vmem>>, vector<1x4x8xbf16>
    %35 = vector.shape_cast %34 : vector<1x4x8xbf16> to vector<4x8xbf16>
    %c6 = arith.constant 6 : index
    %c0_56 = arith.constant 0 : index
    %c0_57 = arith.constant 0 : index
    %36 = vector.load %arg3[%c6, %c0_56, %c0_57] : memref<9x4x8xbf16, #tpu.memory_space<vmem>>, vector<1x4x8xbf16>
    %37 = vector.shape_cast %36 : vector<1x4x8xbf16> to vector<4x8xbf16>
    %c7 = arith.constant 7 : index
    %c0_58 = arith.constant 0 : index
    %c0_59 = arith.constant 0 : index
    %38 = vector.load %arg3[%c7, %c0_58, %c0_59] : memref<9x4x8xbf16, #tpu.memory_space<vmem>>, vector<1x4x8xbf16>
    %39 = vector.shape_cast %38 : vector<1x4x8xbf16> to vector<4x8xbf16>
    %c8 = arith.constant 8 : index
    %c0_60 = arith.constant 0 : index
    %c0_61 = arith.constant 0 : index
    %40 = vector.load %arg3[%c8, %c0_60, %c0_61] : memref<9x4x8xbf16, #tpu.memory_space<vmem>>, vector<1x4x8xbf16>
    %41 = vector.shape_cast %40 : vector<1x4x8xbf16> to vector<4x8xbf16>
    %c0_62 = arith.constant 0 : index
    %c0_63 = arith.constant 0 : index
    %42 = vector.load %arg4[%c0_62, %c0_63] : memref<1x8xf32, #tpu.memory_space<vmem>>, vector<1x8xf32>
    %cst_64 = arith.constant 0.000000e+00 : f32
    %43 = vector.broadcast %cst_64 : f32 to vector<128x8xf32>
    %c0_65 = arith.constant 0 : index
    %c0_66 = arith.constant 0 : index
    %c0_67 = arith.constant 0 : index
    %c0_68 = arith.constant 0 : index
    %c0_69 = arith.constant 0 : index
    %44 = vector.load %arg6[%c0_65, %c0_66, %c0_67, %c0_68, %c0_69] : memref<3x2x10x8x4xbf16, #tpu.memory_space<vmem>>, vector<1x2x8x8x4xbf16>
    %45 = vector.shape_cast %44 : vector<1x2x8x8x4xbf16> to vector<2x8x8x4xbf16>
    %46 = vector.shape_cast %45 : vector<2x8x8x4xbf16> to vector<128x4xbf16>
    %cst_70 = arith.constant dense<0.000000e+00> : vector<128x8xf32>
    %47 = tpu.matmul %46, %25, %cst_70 {dimension_numbers = #tpu.dot_dimension_numbers<[1], [0], [0], [1], [0, 0, 1, 1], [], []>} : vector<128x4xbf16>, vector<4x8xbf16>, vector<128x8xf32> -> vector<128x8xf32>
    %48 = arith.addf %43, %47 : vector<128x8xf32>
    %c1_71 = arith.constant 1 : index
    %c0_72 = arith.constant 0 : index
    %c0_73 = arith.constant 0 : index
    %c0_74 = arith.constant 0 : index
    %c0_75 = arith.constant 0 : index
    %49 = vector.load %arg6[%c1_71, %c0_72, %c0_73, %c0_74, %c0_75] : memref<3x2x10x8x4xbf16, #tpu.memory_space<vmem>>, vector<1x2x8x8x4xbf16>
    %50 = vector.shape_cast %49 : vector<1x2x8x8x4xbf16> to vector<2x8x8x4xbf16>
    %51 = vector.shape_cast %50 : vector<2x8x8x4xbf16> to vector<128x4xbf16>
    %cst_76 = arith.constant dense<0.000000e+00> : vector<128x8xf32>
    %52 = tpu.matmul %51, %27, %cst_76 {dimension_numbers = #tpu.dot_dimension_numbers<[1], [0], [0], [1], [0, 0, 1, 1], [], []>} : vector<128x4xbf16>, vector<4x8xbf16>, vector<128x8xf32> -> vector<128x8xf32>
    %53 = arith.addf %48, %52 : vector<128x8xf32>
    %c2_77 = arith.constant 2 : index
    %c0_78 = arith.constant 0 : index
    %c0_79 = arith.constant 0 : index
    %c0_80 = arith.constant 0 : index
    %c0_81 = arith.constant 0 : index
    %54 = vector.load %arg6[%c2_77, %c0_78, %c0_79, %c0_80, %c0_81] : memref<3x2x10x8x4xbf16, #tpu.memory_space<vmem>>, vector<1x2x8x8x4xbf16>
    %55 = vector.shape_cast %54 : vector<1x2x8x8x4xbf16> to vector<2x8x8x4xbf16>
    %56 = vector.shape_cast %55 : vector<2x8x8x4xbf16> to vector<128x4xbf16>
    %cst_82 = arith.constant dense<0.000000e+00> : vector<128x8xf32>
    %57 = tpu.matmul %56, %29, %cst_82 {dimension_numbers = #tpu.dot_dimension_numbers<[1], [0], [0], [1], [0, 0, 1, 1], [], []>} : vector<128x4xbf16>, vector<4x8xbf16>, vector<128x8xf32> -> vector<128x8xf32>
    %58 = arith.addf %53, %57 : vector<128x8xf32>
    %c0_83 = arith.constant 0 : index
    %c0_84 = arith.constant 0 : index
    %c1_85 = arith.constant 1 : index
    %c0_86 = arith.constant 0 : index
    %c0_87 = arith.constant 0 : index
    %59 = vector.load %arg6[%c0_83, %c0_84, %c1_85, %c0_86, %c0_87] : memref<3x2x10x8x4xbf16, #tpu.memory_space<vmem>>, vector<1x2x8x8x4xbf16>
    %60 = vector.shape_cast %59 : vector<1x2x8x8x4xbf16> to vector<2x8x8x4xbf16>
    %61 = vector.shape_cast %60 : vector<2x8x8x4xbf16> to vector<128x4xbf16>
    %cst_88 = arith.constant dense<0.000000e+00> : vector<128x8xf32>
    %62 = tpu.matmul %61, %31, %cst_88 {dimension_numbers = #tpu.dot_dimension_numbers<[1], [0], [0], [1], [0, 0, 1, 1], [], []>} : vector<128x4xbf16>, vector<4x8xbf16>, vector<128x8xf32> -> vector<128x8xf32>
    %63 = arith.addf %58, %62 : vector<128x8xf32>
    %c1_89 = arith.constant 1 : index
    %c0_90 = arith.constant 0 : index
    %c1_91 = arith.constant 1 : index
    %c0_92 = arith.constant 0 : index
    %c0_93 = arith.constant 0 : index
    %64 = vector.load %arg6[%c1_89, %c0_90, %c1_91, %c0_92, %c0_93] : memref<3x2x10x8x4xbf16, #tpu.memory_space<vmem>>, vector<1x2x8x8x4xbf16>
    %65 = vector.shape_cast %64 : vector<1x2x8x8x4xbf16> to vector<2x8x8x4xbf16>
    %66 = vector.shape_cast %65 : vector<2x8x8x4xbf16> to vector<128x4xbf16>
    %cst_94 = arith.constant dense<0.000000e+00> : vector<128x8xf32>
    %67 = tpu.matmul %66, %33, %cst_94 {dimension_numbers = #tpu.dot_dimension_numbers<[1], [0], [0], [1], [0, 0, 1, 1], [], []>} : vector<128x4xbf16>, vector<4x8xbf16>, vector<128x8xf32> -> vector<128x8xf32>
    %68 = arith.addf %63, %67 : vector<128x8xf32>
    %c2_95 = arith.constant 2 : index
    %c0_96 = arith.constant 0 : index
    %c1_97 = arith.constant 1 : index
    %c0_98 = arith.constant 0 : index
    %c0_99 = arith.constant 0 : index
    %69 = vector.load %arg6[%c2_95, %c0_96, %c1_97, %c0_98, %c0_99] : memref<3x2x10x8x4xbf16, #tpu.memory_space<vmem>>, vector<1x2x8x8x4xbf16>
    %70 = vector.shape_cast %69 : vector<1x2x8x8x4xbf16> to vector<2x8x8x4xbf16>
    %71 = vector.shape_cast %70 : vector<2x8x8x4xbf16> to vector<128x4xbf16>
    %cst_100 = arith.constant dense<0.000000e+00> : vector<128x8xf32>
    %72 = tpu.matmul %71, %35, %cst_100 {dimension_numbers = #tpu.dot_dimension_numbers<[1], [0], [0], [1], [0, 0, 1, 1], [], []>} : vector<128x4xbf16>, vector<4x8xbf16>, vector<128x8xf32> -> vector<128x8xf32>
    %73 = arith.addf %68, %72 : vector<128x8xf32>
    %c0_101 = arith.constant 0 : index
    %c0_102 = arith.constant 0 : index
    %c2_103 = arith.constant 2 : index
    %c0_104 = arith.constant 0 : index
    %c0_105 = arith.constant 0 : index
    %74 = vector.load %arg6[%c0_101, %c0_102, %c2_103, %c0_104, %c0_105] : memref<3x2x10x8x4xbf16, #tpu.memory_space<vmem>>, vector<1x2x8x8x4xbf16>
    %75 = vector.shape_cast %74 : vector<1x2x8x8x4xbf16> to vector<2x8x8x4xbf16>
    %76 = vector.shape_cast %75 : vector<2x8x8x4xbf16> to vector<128x4xbf16>
    %cst_106 = arith.constant dense<0.000000e+00> : vector<128x8xf32>
    %77 = tpu.matmul %76, %37, %cst_106 {dimension_numbers = #tpu.dot_dimension_numbers<[1], [0], [0], [1], [0, 0, 1, 1], [], []>} : vector<128x4xbf16>, vector<4x8xbf16>, vector<128x8xf32> -> vector<128x8xf32>
    %78 = arith.addf %73, %77 : vector<128x8xf32>
    %c1_107 = arith.constant 1 : index
    %c0_108 = arith.constant 0 : index
    %c2_109 = arith.constant 2 : index
    %c0_110 = arith.constant 0 : index
    %c0_111 = arith.constant 0 : index
    %79 = vector.load %arg6[%c1_107, %c0_108, %c2_109, %c0_110, %c0_111] : memref<3x2x10x8x4xbf16, #tpu.memory_space<vmem>>, vector<1x2x8x8x4xbf16>
    %80 = vector.shape_cast %79 : vector<1x2x8x8x4xbf16> to vector<2x8x8x4xbf16>
    %81 = vector.shape_cast %80 : vector<2x8x8x4xbf16> to vector<128x4xbf16>
    %cst_112 = arith.constant dense<0.000000e+00> : vector<128x8xf32>
    %82 = tpu.matmul %81, %39, %cst_112 {dimension_numbers = #tpu.dot_dimension_numbers<[1], [0], [0], [1], [0, 0, 1, 1], [], []>} : vector<128x4xbf16>, vector<4x8xbf16>, vector<128x8xf32> -> vector<128x8xf32>
    %83 = arith.addf %78, %82 : vector<128x8xf32>
    %c2_113 = arith.constant 2 : index
    %c0_114 = arith.constant 0 : index
    %c2_115 = arith.constant 2 : index
    %c0_116 = arith.constant 0 : index
    %c0_117 = arith.constant 0 : index
    %84 = vector.load %arg6[%c2_113, %c0_114, %c2_115, %c0_116, %c0_117] : memref<3x2x10x8x4xbf16, #tpu.memory_space<vmem>>, vector<1x2x8x8x4xbf16>
    %85 = vector.shape_cast %84 : vector<1x2x8x8x4xbf16> to vector<2x8x8x4xbf16>
    %86 = vector.shape_cast %85 : vector<2x8x8x4xbf16> to vector<128x4xbf16>
    %cst_118 = arith.constant dense<0.000000e+00> : vector<128x8xf32>
    %87 = tpu.matmul %86, %41, %cst_118 {dimension_numbers = #tpu.dot_dimension_numbers<[1], [0], [0], [1], [0, 0, 1, 1], [], []>} : vector<128x4xbf16>, vector<4x8xbf16>, vector<128x8xf32> -> vector<128x8xf32>
    %88 = arith.addf %83, %87 : vector<128x8xf32>
    %89 = vector.broadcast %42 : vector<1x8xf32> to vector<128x8xf32>
    %90 = arith.addf %88, %89 : vector<128x8xf32>
    %91 = vector.shape_cast %90 : vector<128x8xf32> to vector<2x8x8x8xf32>
    %92 = arith.truncf %91 : vector<2x8x8x8xf32> to vector<2x8x8x8xbf16>
    %c0_119 = arith.constant 0 : index
    %c0_120 = arith.constant 0 : index
    %c0_121 = arith.constant 0 : index
    %c0_122 = arith.constant 0 : index
    %93 = vector.load %arg5[%c0_119, %c0_120, %c0_121, %c0_122] : memref<2x8x8x8xbf16, #tpu.memory_space<vmem>>, vector<2x8x8x8xbf16>
    tpu.vector_store %arg5[%c0_119, %c0_120, %c0_121, %c0_122], %92 {strides = array<i32>} : memref<2x8x8x8xbf16, #tpu.memory_space<vmem>>, vector<2x8x8x8xbf16>,
    return
  }
  func.func @transform_0(%arg0: i32, %arg1: i32) -> (i32, i32, i32, i32) {
    %c0_i32 = arith.constant 0 : i32
    %c0_i32_0 = arith.constant 0 : i32
    %c0_i32_1 = arith.constant 0 : i32
    return %arg0, %c0_i32, %arg1, %c0_i32_0 : i32, i32, i32, i32
  }
  func.func @transform_1(%arg0: i32, %arg1: i32) -> (i32, i32, i32) {
    %c0_i32 = arith.constant 0 : i32
    %c0_i32_0 = arith.constant 0 : i32
    %c0_i32_1 = arith.constant 0 : i32
    %c0_i32_2 = arith.constant 0 : i32
    return %c0_i32, %c0_i32_0, %c0_i32_1 : i32, i32, i32
  }
  func.func @transform_2(%arg0: i32, %arg1: i32) -> (i32, i32) {
    %c0_i32 = arith.constant 0 : i32
    %c0_i32_0 = arith.constant 0 : i32
    %c0_i32_1 = arith.constant 0 : i32
    return %c0_i32, %c0_i32_0 : i32, i32
  }
  func.func @transform_3(%arg0: i32, %arg1: i32) -> (i32, i32, i32, i32) {
    %c0_i32 = arith.constant 0 : i32
    %c0_i32_0 = arith.constant 0 : i32
    %c0_i32_1 = arith.constant 0 : i32
    return %arg0, %c0_i32, %arg1, %c0_i32_0 : i32, i32, i32, i32
  }
}

module attributes {stable_mosaic.version = 11 : i64} {
  func.func @_halo_conv_kernel(%arg0: i32, %arg1: i32, %arg2: memref<1x4x32x8xbf16, #tpu.memory_space<vmem>>, %arg3: memref<3x8x8xbf16, #tpu.memory_space<vmem>>, %arg4: memref<1x8xf32, #tpu.memory_space<vmem>>, %arg5: memref<1x4x32x8xf32, #tpu.memory_space<vmem>>, %arg6: memref<1x1x6x32x8xbf16, #tpu.memory_space<vmem>>) attributes {dimension_semantics = [#tpu.dimension_semantics<parallel>, #tpu.dimension_semantics<parallel>], iteration_bounds = array<i64: 2, 2>, scalar_prefetch = 0 : i64, scratch_operands = 1 : i64, tpu.core_type = #tpu.core_type<tc>, window_params = [{transform_indices = @transform_0, window_bounds = array<i64: 1, 4, 32, 8>}, {pipeline_mode = #tpu.pipeline_mode<synchronous>, transform_indices = @transform_1, window_bounds = array<i64: 3, 8, 8>}, {pipeline_mode = #tpu.pipeline_mode<synchronous>, transform_indices = @transform_2, window_bounds = array<i64: 1, 8>}, {transform_indices = @transform_3, window_bounds = array<i64: 1, 4, 32, 8>}]} {
    %cst = arith.constant 0.000000e+00 : bf16
    %0 = vector.broadcast %cst : bf16 to vector<1x6x32x8xbf16>
    %c0 = arith.constant 0 : index
    %c0_0 = arith.constant 0 : index
    %c0_1 = arith.constant 0 : index
    %c0_2 = arith.constant 0 : index
    %c0_3 = arith.constant 0 : index
    %1 = vector.load %arg6[%c0, %c0_0, %c0_1, %c0_2, %c0_3] : memref<1x1x6x32x8xbf16, #tpu.memory_space<vmem>>, vector<1x1x6x32x8xbf16>
    %2 = vector.shape_cast %1 : vector<1x1x6x32x8xbf16> to vector<1x6x32x8xbf16>
    %3 = vector.shape_cast %0 : vector<1x6x32x8xbf16> to vector<1x1x6x32x8xbf16>
    tpu.vector_store %arg6[%c0, %c0_0, %c0_1, %c0_2, %c0_3], %3 {strides = array<i32>} : memref<1x1x6x32x8xbf16, #tpu.memory_space<vmem>>, vector<1x1x6x32x8xbf16>,
    %c0_4 = arith.constant 0 : index
    %c0_5 = arith.constant 0 : index
    %c0_6 = arith.constant 0 : index
    %c0_7 = arith.constant 0 : index
    %4 = vector.load %arg2[%c0_4, %c0_5, %c0_6, %c0_7] : memref<1x4x32x8xbf16, #tpu.memory_space<vmem>>, vector<1x4x32x8xbf16>
    %c0_8 = arith.constant 0 : index
    %c0_9 = arith.constant 0 : index
    %c1 = arith.constant 1 : index
    %c0_10 = arith.constant 0 : index
    %c0_11 = arith.constant 0 : index
    %5 = vector.load %arg6[%c0_8, %c0_9, %c1, %c0_10, %c0_11] : memref<1x1x6x32x8xbf16, #tpu.memory_space<vmem>>, vector<1x1x4x32x8xbf16>
    %6 = vector.shape_cast %5 : vector<1x1x4x32x8xbf16> to vector<1x4x32x8xbf16>
    %7 = vector.shape_cast %4 : vector<1x4x32x8xbf16> to vector<1x1x4x32x8xbf16>
    tpu.vector_store %arg6[%c0_8, %c0_9, %c1, %c0_10, %c0_11], %7 {strides = array<i32>} : memref<1x1x6x32x8xbf16, #tpu.memory_space<vmem>>, vector<1x1x4x32x8xbf16>,
    %c0_12 = arith.constant 0 : index
    %c0_13 = arith.constant 0 : index
    %c0_14 = arith.constant 0 : index
    %8 = vector.load %arg3[%c0_12, %c0_13, %c0_14] : memref<3x8x8xbf16, #tpu.memory_space<vmem>>, vector<1x8x8xbf16>
    %9 = vector.shape_cast %8 : vector<1x8x8xbf16> to vector<8x8xbf16>
    %c1_15 = arith.constant 1 : index
    %c0_16 = arith.constant 0 : index
    %c0_17 = arith.constant 0 : index
    %10 = vector.load %arg3[%c1_15, %c0_16, %c0_17] : memref<3x8x8xbf16, #tpu.memory_space<vmem>>, vector<1x8x8xbf16>
    %11 = vector.shape_cast %10 : vector<1x8x8xbf16> to vector<8x8xbf16>
    %c2 = arith.constant 2 : index
    %c0_18 = arith.constant 0 : index
    %c0_19 = arith.constant 0 : index
    %12 = vector.load %arg3[%c2, %c0_18, %c0_19] : memref<3x8x8xbf16, #tpu.memory_space<vmem>>, vector<1x8x8xbf16>
    %13 = vector.shape_cast %12 : vector<1x8x8xbf16> to vector<8x8xbf16>
    %c0_20 = arith.constant 0 : index
    %c0_21 = arith.constant 0 : index
    %14 = vector.load %arg4[%c0_20, %c0_21] : memref<1x8xf32, #tpu.memory_space<vmem>>, vector<1x8xf32>
    %cst_22 = arith.constant 0.000000e+00 : f32
    %15 = vector.broadcast %cst_22 : f32 to vector<128x8xf32>
    %c0_23 = arith.constant 0 : index
    %c0_24 = arith.constant 0 : index
    %c0_25 = arith.constant 0 : index
    %c0_26 = arith.constant 0 : index
    %c0_27 = arith.constant 0 : index
    %16 = vector.load %arg6[%c0_23, %c0_24, %c0_25, %c0_26, %c0_27] : memref<1x1x6x32x8xbf16, #tpu.memory_space<vmem>>, vector<1x1x4x32x8xbf16>
    %17 = vector.shape_cast %16 : vector<1x1x4x32x8xbf16> to vector<1x4x32x8xbf16>
    %18 = vector.shape_cast %17 : vector<1x4x32x8xbf16> to vector<128x8xbf16>
    %cst_28 = arith.constant dense<0.000000e+00> : vector<128x8xf32>
    %19 = tpu.matmul %18, %9, %cst_28 {dimension_numbers = #tpu.dot_dimension_numbers<[1], [0], [0], [1], [0, 0, 1, 1], [], []>} : vector<128x8xbf16>, vector<8x8xbf16>, vector<128x8xf32> -> vector<128x8xf32>
    %20 = arith.addf %15, %19 : vector<128x8xf32>
    %c0_29 = arith.constant 0 : index
    %c0_30 = arith.constant 0 : index
    %c1_31 = arith.constant 1 : index
    %c0_32 = arith.constant 0 : index
    %c0_33 = arith.constant 0 : index
    %21 = vector.load %arg6[%c0_29, %c0_30, %c1_31, %c0_32, %c0_33] : memref<1x1x6x32x8xbf16, #tpu.memory_space<vmem>>, vector<1x1x4x32x8xbf16>
    %22 = vector.shape_cast %21 : vector<1x1x4x32x8xbf16> to vector<1x4x32x8xbf16>
    %23 = vector.shape_cast %22 : vector<1x4x32x8xbf16> to vector<128x8xbf16>
    %cst_34 = arith.constant dense<0.000000e+00> : vector<128x8xf32>
    %24 = tpu.matmul %23, %11, %cst_34 {dimension_numbers = #tpu.dot_dimension_numbers<[1], [0], [0], [1], [0, 0, 1, 1], [], []>} : vector<128x8xbf16>, vector<8x8xbf16>, vector<128x8xf32> -> vector<128x8xf32>
    %25 = arith.addf %20, %24 : vector<128x8xf32>
    %c0_35 = arith.constant 0 : index
    %c0_36 = arith.constant 0 : index
    %c2_37 = arith.constant 2 : index
    %c0_38 = arith.constant 0 : index
    %c0_39 = arith.constant 0 : index
    %26 = vector.load %arg6[%c0_35, %c0_36, %c2_37, %c0_38, %c0_39] : memref<1x1x6x32x8xbf16, #tpu.memory_space<vmem>>, vector<1x1x4x32x8xbf16>
    %27 = vector.shape_cast %26 : vector<1x1x4x32x8xbf16> to vector<1x4x32x8xbf16>
    %28 = vector.shape_cast %27 : vector<1x4x32x8xbf16> to vector<128x8xbf16>
    %cst_40 = arith.constant dense<0.000000e+00> : vector<128x8xf32>
    %29 = tpu.matmul %28, %13, %cst_40 {dimension_numbers = #tpu.dot_dimension_numbers<[1], [0], [0], [1], [0, 0, 1, 1], [], []>} : vector<128x8xbf16>, vector<8x8xbf16>, vector<128x8xf32> -> vector<128x8xf32>
    %30 = arith.addf %25, %29 : vector<128x8xf32>
    %31 = vector.broadcast %14 : vector<1x8xf32> to vector<128x8xf32>
    %32 = arith.addf %30, %31 : vector<128x8xf32>
    %33 = vector.shape_cast %32 : vector<128x8xf32> to vector<1x4x32x8xf32>
    %c0_41 = arith.constant 0 : index
    %c0_42 = arith.constant 0 : index
    %c0_43 = arith.constant 0 : index
    %c0_44 = arith.constant 0 : index
    %34 = vector.load %arg5[%c0_41, %c0_42, %c0_43, %c0_44] : memref<1x4x32x8xf32, #tpu.memory_space<vmem>>, vector<1x4x32x8xf32>
    tpu.vector_store %arg5[%c0_41, %c0_42, %c0_43, %c0_44], %33 {strides = array<i32>} : memref<1x4x32x8xf32, #tpu.memory_space<vmem>>, vector<1x4x32x8xf32>,
    return
  }
  func.func @transform_0(%arg0: i32, %arg1: i32) -> (i32, i32, i32, i32) {
    %c0_i32 = arith.constant 0 : i32
    %c0_i32_0 = arith.constant 0 : i32
    %c0_i32_1 = arith.constant 0 : i32
    return %arg0, %c0_i32, %arg1, %c0_i32_0 : i32, i32, i32, i32
  }
  func.func @transform_1(%arg0: i32, %arg1: i32) -> (i32, i32, i32) {
    %c0_i32 = arith.constant 0 : i32
    %c0_i32_0 = arith.constant 0 : i32
    %c0_i32_1 = arith.constant 0 : i32
    %c0_i32_2 = arith.constant 0 : i32
    return %c0_i32, %c0_i32_0, %c0_i32_1 : i32, i32, i32
  }
  func.func @transform_2(%arg0: i32, %arg1: i32) -> (i32, i32) {
    %c0_i32 = arith.constant 0 : i32
    %c0_i32_0 = arith.constant 0 : i32
    %c0_i32_1 = arith.constant 0 : i32
    return %c0_i32, %c0_i32_0 : i32, i32
  }
  func.func @transform_3(%arg0: i32, %arg1: i32) -> (i32, i32, i32, i32) {
    %c0_i32 = arith.constant 0 : i32
    %c0_i32_0 = arith.constant 0 : i32
    %c0_i32_1 = arith.constant 0 : i32
    return %arg0, %c0_i32, %arg1, %c0_i32_0 : i32, i32, i32, i32
  }
}

</mosaic_0001>

<bundles_post_ra>
// kernel: pseudo3d_conv.3
= control target key start
LH: loop header
LB: loop body
LE: loop exit
PB: predicated region body
PF: predicated region fallthrough
CT: control target
= control target key end

     0   :  { %8 = vsyncpa [#allocation4], 0  ;;  %s1783_s0 = inlined_call_operand.hbm [shape: bf16[2,4,64,8], index: 0, kind: input, shape index: {}]   ;;  %s1784_s1 = inlined_call_operand.hbm [shape: bf16[3,8,8], index: 1, kind: input, shape index: {}]   ;;  %s1785_s2 = inlined_call_operand.hbm [shape: f32[1,8], index: 2, kind: input, shape index: {}]   ;;  %s1786_s3 = inlined_call_operand.hbm [shape: f32[2,4,64,8], index: 3, kind: output, shape index: {}]  }
   0x1   :  { %10 = vsyncpa [#allocation4 + $0x1], 0 }
   0x2   :  { %11 = vsyncpa [#allocation7], 0 }
   0x3   :  { %12 = vsyncpa [#allocation5], 0 }
   0x4   :  { %14 = vsyncpa [#allocation5 + $0x1], 0  ;;  %s1434_s12 = smov 0   ;;  %s1436_s13 = smov 0  }
   0x5   :  { %s1438_s14 = smov 0   ;;  %s1440_s15 = smov 0  }
   0x6   :  { %s1442_s16 = smov 0   ;;  %s1444_s17 = smov 0  }
   0x7   :  { %s1446_s18 = smov 0   ;;  %s1448_s19 = smov 0  }
   0x8 LB: > { %s960_s20 = sadd.s32 4294967295, %s1395_s19   ;;  %s961_s21 = sadd.s32 4294967294, %s1395_s19   ;;  %s1395_s19 = sphi %s1448_s19, %s20_s19   ;;  %s1391_s18 = sphi %s1446_s18, %s1823_s18   ;;  %s1387_s17 = sphi %s1444_s17, %s1822_s17   ;;  %s1383_s16 = sphi %s1442_s16, %s1821_s16   ;;  %s1379_s15 = sphi %s1440_s15, %s1820_s15   ;;  %s1375_s14 = sphi %s1438_s14, %s1819_s14   ;;  %s1371_s13 = sphi %s1436_s13, %s1818_s13   ;;  %s1367_s12 = sphi %s1434_s12, %s1817_s12  }
   0x9   : > { %s29_s22 = sadd.s32 1, %s1387_s17  ;;  %s32_s23 = sadd.s32 1, %s1391_s18 }
   0xa   : > { %p30_p0 = scmp.ge.s32.totalorder %s29_s22, 2  ;;  %s41_s24 = sadd.s32 1, %s1375_s14 }
   0xb   : > { %p48_p1 = scmp.ne.s32.totalorder %s1375_s14, %s1371_s13  ;;  %p49_p2 = scmp.eq.s32.totalorder %s1395_s19, 0 }
   0xc   : > { %s1825_s22 = smov (%p30_p0, %s29_s22), 0  ;;  %s1827_s23 = smov (!%p30_p0, %s32_s23), %s1391_s18 }
   0xd   : > { %1796 = sst [smem:[#allocation18_spill]] %s1825_s22  ;;  %s37_s25 = ssub.s32 %s1387_s17, %s1825_s22 }
   0xe   : > { %p1487_p3 = por %p49_p2, %p48_p1  ;;  %p34_p4 = scmp.ge.s32.totalorder %s1827_s23, 2 }
   0xf   : > { %p54_p5 = scmp.ne.s32.totalorder %s1371_s13, %s1367_s12  ;;  %p1493_p6 = scmp.eq.s32.totalorder %s960_s20, 0 }
  0x10   : > { %s1797_s26 = scalar_select %p1487_p3, 1, 0 }
  0x11   : > { %s1798_s27 = scalar_select %p1493_p6, 1, 0 }
  0x12   : > { %p122_p7 = scmp.eq.s32.totalorder %s960_s20, 3  ;;  %s1829_s23 = smov (%p34_p4, %s1827_s23), 0 }
  0x13   : > { %1799 = sst [smem:[#allocation19_spill]] %s1829_s23  ;;  %p1501_p8 = por %p1493_p6, %p54_p5 }
  0x14   : > { %p1505_p9 = por %p122_p7, %p48_p1  ;;  %s36_s30 = ssub.s32 %s1391_s18, %s1829_s23 }
  0x15   : > { %s1800_s28 = scalar_select %p1501_p8, 1, 0 }
  0x16   : > { %s1801_s29 = scalar_select %p1505_p9, 1, 0 }
  0x17   : > { %p128_p10 = scmp.eq.s32.totalorder %s961_s21, 3  ;;  %s38_s4 = sor.u32 %s37_s25, %s36_s30 }
  0x18   : > { %p962_p11 = scmp.ge.s32.totalorder %s1395_s19, 1  ;;  %p39_p12 = scmp.eq.s32.totalorder %s38_s4, 0 }
  0x19   : > { %p1512_p13 = por %p128_p10, %p54_p5  ;;  %p135_p0 = scmp.lt.s32.totalorder %s1395_s19, 5 }
  0x1a   : > { %s1518_s6 = scalar_select %p39_p12, %s1375_s14, %s41_s24  }
  0x1b   : > { %s1802_s5 = scalar_select %p1512_p13, 1, 0 }
  0x1c   : > { %1804 = sst [smem:[#allocation21_spill]] %s1518_s6  ;;  %p1520_p2 = pnand %p962_p11, %p135_p0 }
  0x1d   : > { %1803 = sst [smem:[#allocation20_spill]] %s1802_s5  ;;  %s1397_s8 = smov [#allocation6]  }
  0x1e   : > { %s1805_s7 = scalar_select %p1520_p2, 1, 0 }
  0x1f   : > { %s147_s9 = sshll.u32 %s1397_s8, 4  ;;  %p1160_p1 = pneg %p1520_p2  ;;  %s148_s9 = int_to_ptr.vmem [resolvable:$true] %s147_s9 }
  0x20   : > { %s1398_s11 = smov [#allocation8]   ;;  %s1265_s25 = scalar_lea.hbm %s1784_s1, 192 }
  0x21   : > { %p1528_p4 = pnand %p1160_p1, %p1493_p6  ;;  %s161_s20 = sshll.u32 %s1398_s11, 4  ;;  %s1532_s20 = int_to_ptr.vmem [resolvable:$true] %s161_s20 }
  0x22   : > { %p1266_p5 = scmp.ne.s32.totalorder %s1784_s1, %s1265_s25  ;;  %p1272_p12 = scmp.lt.u32.totalorder %s1265_s25, %s1784_s1 }
  0x23   : > { %p1267_p7 = pneg %p1528_p4 }
  0x25   : > { %p1268_p10 = pnand %p1267_p7, %p1266_p5 }
  0x27   : > { %p1269_p11 = pneg %p1268_p10 }
  0x29   : > { %p1274_p0 = pnand %p1272_p12, %p1269_p11 }
  0x2b   : > { %1277 = shalt.err (!%p1274_p0)
}
  0x2c   : > { %s1278_s11 = scalar_lea.vmem %s148_s9, 192  ;;  %p1286_p6 = scmp.lt.s32.totalorder %s148_s9, %s148_s9 }
  0x2d   : > { %p1279_p1 = scmp.ne.s32.totalorder %s148_s9, %s1278_s11  ;;  %p1287_p8 = scmp.lt.s32.totalorder %s1278_s11, %s1278_s11 }
  0x2f   : > { %p1281_p13 = pnand %p1279_p1, %p1267_p7  ;;  %p1288_p2 = por %p1287_p8, %p1286_p6 }
  0x31   : > { %p1282_p9 = pneg %p1281_p13 }
  0x33   : > { %p1289_p3 = pnand %p1288_p2, %p1282_p9 }
  0x35   : > { %1292 = shalt.err (!%p1289_p3)
}
  0x36   : > { %s1399_s21 = smov 64   ;;  %s1400_s24 = smov 4  }
  0x37   : > { %1163 = dma.hbm_to_vmem [thread:$0]  (!%p1528_p4), %s1784_s1, 192, %s148_s9, [#allocation7], %s1399_s21, %s1399_s21, %s1400_s24  }
  0x38   : > { %s1293_s8 = scalar_lea.hbm %s1785_s2, 16 }
  0x39   : > { %p1294_p13 = scmp.ne.s32.totalorder %s1785_s2, %s1293_s8  ;;  %p1300_p8 = scmp.lt.u32.totalorder %s1293_s8, %s1785_s2 }
  0x3b   : > { %p1296_p3 = pnand %p1294_p13, %p1267_p7 }
  0x3d   : > { %p1297_p6 = pneg %p1296_p3 }
  0x3f   : > { %p1302_p9 = pnand %p1300_p8, %p1297_p6 }
  0x41   : > { %1305 = shalt.err (!%p1302_p9)
}
  0x42   : > { %s1306_s9 = scalar_lea.vmem %s1532_s20, 16  ;;  %s1313_s22 = scalar_lea.vmem %s1532_s20, 32 }
  0x43   : > { %p1307_p2 = scmp.ne.s32.totalorder %s1532_s20, %s1306_s9  ;;  %p1314_p11 = scmp.lt.s32.totalorder %s1532_s20, %s1532_s20 }
  0x44   : > { %p1315_p12 = scmp.lt.s32.totalorder %s1313_s22, %s1306_s9 }
  0x45   : > { %p1309_p5 = pnand %p1307_p2, %p1267_p7 }
  0x46   : > { %p1316_p0 = por %p1315_p12, %p1314_p11 }
  0x47   : > { %p1310_p10 = pneg %p1309_p5 }
  0x49   : > { %p1317_p1 = pnand %p1316_p0, %p1310_p10 }
  0x4b   : > { %1320 = shalt.err (!%p1317_p1)
}
  0x4c   : > { %1166 = dma.hbm_to_vmem [thread:$0]  (!%p1528_p4), %s1785_s2, 16, %s1532_s20, [#allocation7]  }
  0x4d   : > { %p965_p13 = scmp.ge.s32.totalorder %s1395_s19, 4 }
  0x4f   : > { %168 = sbr.rel (%p965_p13) target bundleno = 103 (0x67), region = 24 }
  0x56   : > { %s172_s21 = sand.u32 1, %s1375_s14   ;;  %s967_s24 = sshll.u32 %s1387_s17, 2 }
  0x57   : > { %s966_s23 = sshll.u32 %s172_s21, 6  ;;  %s968_s10 = sshll.u32 %s1391_s18, 5 }
  0x58   : > { %s182_s25 = sadd.s32 %s968_s10, %s967_s24  ;;  %s176_s30 = scalar_lea.vmem [#allocation3], %s966_s23 }
  0x59   : > { %s197_s20 = sshll.u32 %s176_s30, 4  ;;  %s969_s4 = sshll.u32 %s182_s25, 6  ;;  %s198_s20 = int_to_ptr.vmem [resolvable:$true] %s197_s20 }
  0x5a   : > { %p1807_p4 = scmp.ne.s32.totalorder %s1797_s26, 0  ;;  %s1401_s11 = smov 512  }
  0x5b   : > { %s1402_s22 = smov 256   ;;  %s1403_s5 = smov 4  }
  0x5c   : > { %s1139_s8 = scalar_select %p1807_p4, [#allocation0], [#allocation14] }
  0x5d   : > { %1140 = sst [smem:[#allocation11]] (%p1807_p4), %s1401_s11  ;;  %s1404_s6 = smov 64  }
  0x5e   : > { %s189_s9 = sld [smem:[%s1139_s8]]   ;;  %s184_s10 = scalar_lea.hbm %s1783_s0, %s969_s4 }
  0x5f   : > { %1141 = sst [smem:[#allocation11 + $0x1]] (%p1807_p4), %s1402_s22  ;;  %s173_s8 = scalar_lea.sflag [#allocation4], %s172_s21 }
  0x60   : > { %1142 = sst [smem:[#allocation11 + $0x2]] (%p1807_p4), %s1403_s5  ;;  %s1405_s11 = smov [#allocation10]  }
  0x61   : > { %1143 = sst [smem:[#allocation11 + $0x3]] (%p1807_p4), %s1404_s6 }
  0x62   : > { %1144 = sst [smem:[#allocation11 + $0x4]] (%p1807_p4), %s1404_s6 }
  0x63   : > { %1145 = sst [smem:[#allocation11 + $0x5]] (%p1807_p4), %s1403_s5 }
  0x64   : > { %s970_s25 = sshll.u32 %s189_s9, 26 }
  0x65   : > { %s971_s30 = sadd.s32 134217728, %s970_s25 }
  0x66   : > { %1146 = dma.general (%p1807_p4), %s184_s10, 1024, %s198_s20, %s173_s8, %s1405_s11, [#allocation11], %s971_s30, 0  }
  0x67 PF: > { %p1808_p7 = scmp.ne.s32.totalorder %s1805_s7, 0 }
  0x68   : > { %s1608_s22 = sand.u32 (!%p1808_p7), 1, %s1371_s13   ;;  %p1809_p3 = scmp.ne.s32.totalorder (!%p1808_p7), %s1800_s28, 0 }
  0x69   : > { %222 = sbr.rel (%p1808_p7) target bundleno = 404 (0x194), region = 32  ;;  %s973_s4 = sshll.u32 (!%p1808_p7), %s1608_s22, 6 }
  0x6a   : > { %s225_s6 = scalar_lea.sflag (!%p1808_p7), [#allocation4], %s1608_s22  ;;  %s1612_s24 = scalar_lea.vmem (!%p1808_p7), [#allocation3], %s973_s4 }
  0x70   : > { %1354 = dma.done.wait (%p1809_p3), %s225_s6, 1024  }
  0x71   : > { %1356 = vsyncadd (%p1809_p3), %s225_s6, 4294966272  ;;  %p1810_p6 = scmp.ne.s32.totalorder %s1798_s27, 0 }
  0x73   : > { %1358 = dma.done.wait (%p1810_p6), [#allocation7], 208  }
  0x74   : > { %1360 = vsyncadd (%p1810_p6), [#allocation7], 4294967088  ;;  %vm262_vm0 = vcmask 64512   ;;  %v1406_v0 = vmov 0   ;;  %vm394_vm1 = vcmask 1043456   ;;  %v1257_v7 = vld [vmem:[%s1612_s24] sm:$0xff]  }
  0x75   : > { %263 = vst.msk [vmem:[#allocation2] sm:$0xff] %vm262_vm0, %v1406_v0  ;;  %264 = vst.msk [vmem:[#allocation2 + $0x8] sm:$0xff] %vm262_vm0, %v1406_v0  ;;  %v348_v1 = vld [vmem:[#allocation6] sm:$0xf]  ;;  %v350_v2 = vld [vmem:[#allocation6 + $0x4] sm:$0xf] }
  0x76   : > { %265 = vst.msk [vmem:[#allocation2 + $0x10] sm:$0xff] %vm262_vm0, %v1406_v0  ;;  %266 = vst.msk [vmem:[#allocation2 + $0x18] sm:$0xff] %vm262_vm0, %v1406_v0  ;;  %1132 = vmatprep.subr.msk.bf16.mxu0 %vm394_vm1, %v348_v1  ;;  %v520_v3 = vsel %vm394_vm1, %v348_v1, 0  ;;  %1131 = vmatprep.subr.msk.bf16.mxu1 %vm394_vm1, %v350_v2  ;;  %v396_v6 = vsel %vm394_vm1, %v350_v2, 0  ;;  %v352_v8 = vld [vmem:[#allocation6 + $0x8] sm:$0xf] }
  0x77   : > { %267 = vst.msk [vmem:[#allocation2 + $0x20] sm:$0xff] %vm262_vm0, %v1406_v0  ;;  %268 = vst.msk [vmem:[#allocation2 + $0x28] sm:$0xff] %vm262_vm0, %v1406_v0  ;;  %1062 = vmatpush3.bf16.msra.mxu0 %v520_v3  ;;  %1044 = vmatpush3.bf16.msra.mxu1 %v396_v6  ;;  %v1258_v9 = vld [vmem:[%s1612_s24 + $0x8] sm:$0xff]   ;;  %v653_v10 = vsel %vm394_vm1, %v352_v8, 0  ;;  %v1259_v11 = vld [vmem:[%s1612_s24 + $0x10] sm:$0xff]   ;;  %s976_s26 = sshll.u32 %s1608_s22, 7 }
  0x78   : > { %269 = vst.msk [vmem:[#allocation2 + $0x30] sm:$0xff] %vm262_vm0, %v1406_v0  ;;  %270 = vst.msk [vmem:[#allocation2 + $0x38] sm:$0xff] %vm262_vm0, %v1406_v0  ;;  %1134 = vmatprep.subr.msk.bf16.mxu0 %vm394_vm1, %v352_v8  ;;  %1133 = vmatprep.subr.msk.bf16.mxu1 %vm394_vm1, %v348_v1  ;;  %v1260_v12 = vld [vmem:[%s1612_s24 + $0x18] sm:$0xff]   ;;  %v1261_v13 = vld [vmem:[%s1612_s24 + $0x20] sm:$0xff]   ;;  %s1686_s27 = scalar_lea.vmem [#allocation9], %s976_s26  ;;  %s807_s28 = scalar_lea.sflag [#allocation5], %s1608_s22 }
  0x79   : > { %271 = vst.msk [vmem:[#allocation2 + $0x40] sm:$0xff] %vm262_vm0, %v1406_v0  ;;  %272 = vst.msk [vmem:[#allocation2 + $0x48] sm:$0xff] %vm262_vm0, %v1406_v0  ;;  %v1262_v14 = vld [vmem:[%s1612_s24 + $0x28] sm:$0xff]   ;;  %v1263_v15 = vld [vmem:[%s1612_s24 + $0x30] sm:$0xff]  }
  0x7a   : > { %273 = vst.msk [vmem:[#allocation2 + $0x50] sm:$0xff] %vm262_vm0, %v1406_v0  ;;  %274 = vst.msk [vmem:[#allocation2 + $0x58] sm:$0xff] %vm262_vm0, %v1406_v0  ;;  %v1264_v16 = vld [vmem:[%s1612_s24 + $0x38] sm:$0xff]   ;;  %v1682_v32 = vld [vmem:[#allocation8] ss:$0 sm:$0xff] }
  0x7b   : > { %340 = vst.msk [vmem:[#allocation2 + $0x10] sm:$0xff] %vm262_vm0, %v1257_v7  ;;  %341 = vst.msk [vmem:[#allocation2 + $0x18] sm:$0xff] %vm262_vm0, %v1258_v9 }
  0x7c   : > { %v354_v4 = vld [vmem:[#allocation2] sm:$0xff]  ;;  %v355_v5 = vld [vmem:[#allocation2 + $0x8] sm:$0xff]  ;;  %342 = vst.msk [vmem:[#allocation2 + $0x20] sm:$0xff] %vm262_vm0, %v1259_v11  ;;  %343 = vst.msk [vmem:[#allocation2 + $0x28] sm:$0xff] %vm262_vm0, %v1260_v12 }
  0x7d   : > { %1063 = vmatprep.mubr.msk.bf16.mxu0 %vm262_vm0, %v354_v4  ;;  %344 = vst.msk [vmem:[#allocation2 + $0x30] sm:$0xff] %vm262_vm0, %v1261_v13  ;;  %345 = vst.msk [vmem:[#allocation2 + $0x38] sm:$0xff] %vm262_vm0, %v1262_v14 }
  0x7e   : > { %1064 = vmatmul.mubr.msk.bf16.vlgmr.msra.gmra.mrb[0].mxu0 %vm262_vm0, %v355_v5  ;;  %346 = vst.msk [vmem:[#allocation2 + $0x40] sm:$0xff] %vm262_vm0, %v1263_v15  ;;  %347 = vst.msk [vmem:[#allocation2 + $0x48] sm:$0xff] %vm262_vm0, %v1264_v16 }
  0x7f   : > { %1080 = vmatpush3.bf16.msra.mxu0 %v653_v10 }
  0x81   : > { %v626_v25 = vld [vmem:[#allocation2 + $0x50] sm:$0xff]  ;;  %v627_v26 = vld [vmem:[#allocation2 + $0x58] sm:$0xff] }
  0x82   : > { %v362_v17 = vld [vmem:[#allocation2 + $0x10] sm:$0xff]  ;;  %v363_v18 = vld [vmem:[#allocation2 + $0x18] sm:$0xff] }
  0x83   : > { %1045 = vmatprep.mubr.msk.bf16.mxu1 %vm262_vm0, %v362_v17  ;;  %1067 = vmatprep.mubr.msk.bf16.mxu0 %vm262_vm0, %v362_v17  ;;  %v364_v19 = vld [vmem:[#allocation2 + $0x20] sm:$0xff]  ;;  %v365_v20 = vld [vmem:[#allocation2 + $0x28] sm:$0xff] }
  0x84   : > { %1046 = vmatmul.mubr.msk.bf16.vlgmr.msra.gmra.mrb[0].mxu1 %vm262_vm0, %v363_v18  ;;  %v366_v21 = vld [vmem:[#allocation2 + $0x30] sm:$0xff]  ;;  %v367_v22 = vld [vmem:[#allocation2 + $0x38] sm:$0xff] }
  0x85   : > { %1098 = vmatpush3.bf16.msra.mxu1 %v520_v3  ;;  %1049 = vmatprep.mubr.msk.bf16.mxu1 %vm262_vm0, %v364_v19  ;;  %v368_v23 = vld [vmem:[#allocation2 + $0x40] sm:$0xff]  ;;  %v369_v24 = vld [vmem:[#allocation2 + $0x48] sm:$0xff] }
  0x86   : > { %1068 = vmatmul.mubr.msk.bf16.gmra.mrb[4].mxu0 %vm262_vm0, %v363_v18 }
  0x87   : > { %1081 = vmatprep.mubr.msk.bf16.mxu0 %vm262_vm0, %v364_v19 }
  0x8c   : > { %1050 = vmatmul.mubr.msk.bf16.gmra.mrb[4].mxu1 %vm262_vm0, %v365_v20 }
  0x8d   : > { %1053 = vmatprep.mubr.msk.bf16.mxu1 %vm262_vm0, %v366_v21 }
  0x8e   : > { %1082 = vmatmul.mubr.msk.bf16.vlgmr.msra.gmra.mrb[0].mxu0 %vm262_vm0, %v365_v20 }
  0x8f   : > { %1085 = vmatprep.mubr.msk.bf16.mxu0 %vm262_vm0, %v366_v21 }
  0x94   : > { %1054 = vmatmul.mubr.msk.bf16.gmra.mrb[8].mxu1 %vm262_vm0, %v367_v22 }
  0x95   : > { %1057 = vmatprep.mubr.msk.bf16.mxu1 %vm262_vm0, %v368_v23 }
  0x96   : > { %1086 = vmatmul.mubr.msk.bf16.gmra.mrb[4].mxu0 %vm262_vm0, %v367_v22 }
  0x97   : > { %1089 = vmatprep.mubr.msk.bf16.mxu0 %vm262_vm0, %v368_v23 }
  0x9c   : > { %1058 = vmatmul.mubr.msk.bf16.gmra.mrb[12].mxu1 %vm262_vm0, %v369_v24 }
  0x9d   : > { %1071 = vmatprep.mubr.msk.bf16.mxu1 %vm262_vm0, %v364_v19 }
  0x9e   : > { %1090 = vmatmul.mubr.msk.bf16.gmra.mrb[8].mxu0 %vm262_vm0, %v369_v24 }
  0x9f   : > { %1093 = vmatprep.mubr.msk.bf16.mxu0 %vm262_vm0, %v626_v25 }
  0xa4   : > { %1072 = vmatmul.mubr.msk.bf16.vlgmr.msra.gmra.mrb[8].mxu1 %vm262_vm0, %v365_v20 }
  0xa5   : > { %1075 = vmatprep.mubr.msk.bf16.mxu1 %vm262_vm0, %v366_v21 }
  0xa6   : > { %1094 = vmatmul.mubr.msk.bf16.gmra.mrb[12].mxu0 %vm262_vm0, %v627_v26 }
  0xac   : > { %1076 = vmatmul.mubr.msk.bf16.gmra.mrb[12].mxu1 %vm262_vm0, %v367_v22 }
 0x157   : > { %v1047_v27 = vpop.f32.mrb[0].mxu1 }
 0x158   : > { %v432_v28 = vpop.f32.mrb[1].mxu1 }
 0x159   : > { %v1048_v29 = vpop.f32.mrb[2].mxu1 }
 0x15a   : > { %v435_v30 = vpop.f32.mrb[3].mxu1 }
 0x15f   : > { %v1051_v31 = vpop.f32.mrb[4].mxu1 }
 0x160   : > { %v448_v34 = vpop.f32.mrb[5].mxu1 }
 0x161   : > { %v1083_v33 = vpop.f32.mrb[0].mxu0  ;;  %v1052_v37 = vpop.f32.mrb[6].mxu1 }
 0x162   : > { %v1099_v35 = vadd.f32 %v1083_v33, %v1047_v27  ;;  %v689_v36 = vpop.f32.mrb[1].mxu0  ;;  %v451_v41 = vpop.f32.mrb[7].mxu1 }
 0x163   : > { %v1100_v38 = vadd.f32 %v689_v36, %v432_v28  ;;  %v1084_v39 = vpop.f32.mrb[2].mxu0 }
 0x164   : > { %v776_v40 = vadd.f32 %v1099_v35, %v1682_v32  ;;  %v1101_v42 = vadd.f32 %v1084_v39, %v1048_v29  ;;  %v692_v43 = vpop.f32.mrb[3].mxu0 }
 0x165   : > { %v774_v44 = vadd.f32 %v1100_v38, %v1682_v32  ;;  %v1102_v45 = vadd.f32 %v692_v43, %v435_v30 }
 0x166   : > { %792 = vst.msk [vmem:[%s1686_s27 + $0x10] sm:$0xff] %vm262_vm0, %v776_v40  ;;  %v777_v46 = vadd.f32 %v1101_v42, %v1682_v32 }
 0x167   : > { %790 = vst.msk [vmem:[%s1686_s27] sm:$0xff] %vm262_vm0, %v774_v44  ;;  %v775_v47 = vadd.f32 %v1102_v45, %v1682_v32 }
 0x168   : > { %793 = vst.msk [vmem:[%s1686_s27 + $0x18] sm:$0xff] %vm262_vm0, %v777_v46 }
 0x169   : > { %791 = vst.msk [vmem:[%s1686_s27 + $0x8] sm:$0xff] %vm262_vm0, %v775_v47  ;;  %v1087_v48 = vpop.f32.mrb[4].mxu0 }
 0x16a   : > { %v1103_v49 = vadd.f32 %v1087_v48, %v1051_v31  ;;  %v705_v50 = vpop.f32.mrb[5].mxu0 }
 0x16b   : > { %v1104_v51 = vadd.f32 %v705_v50, %v448_v34  ;;  %v1088_v52 = vpop.f32.mrb[6].mxu0 }
 0x16c   : > { %v780_v53 = vadd.f32 %v1103_v49, %v1682_v32  ;;  %v1105_v54 = vadd.f32 %v1088_v52, %v1052_v37  ;;  %v708_v55 = vpop.f32.mrb[7].mxu0 }
 0x16d   : > { %v778_v56 = vadd.f32 %v1104_v51, %v1682_v32  ;;  %v1106_v57 = vadd.f32 %v708_v55, %v451_v41 }
 0x16e   : > { %796 = vst.msk [vmem:[%s1686_s27 + $0x30] sm:$0xff] %vm262_vm0, %v780_v53  ;;  %v781_v58 = vadd.f32 %v1105_v54, %v1682_v32 }
 0x16f   : > { %794 = vst.msk [vmem:[%s1686_s27 + $0x20] sm:$0xff] %vm262_vm0, %v778_v56  ;;  %v779_v59 = vadd.f32 %v1106_v57, %v1682_v32 }
 0x170   : > { %797 = vst.msk [vmem:[%s1686_s27 + $0x38] sm:$0xff] %vm262_vm0, %v781_v58 }
 0x171   : > { %795 = vst.msk [vmem:[%s1686_s27 + $0x28] sm:$0xff] %vm262_vm0, %v779_v59  ;;  %v1091_v60 = vpop.f32.mrb[8].mxu0 }
 0x172   : > { %v721_v61 = vpop.f32.mrb[9].mxu0 }
 0x173   : > { %v1092_v62 = vpop.f32.mrb[10].mxu0 }
 0x174   : > { %v724_v63 = vpop.f32.mrb[11].mxu0 }
 0x177   : > { %v1073_v0 = vpop.f32.mrb[8].mxu1 }
 0x178   : > { %v1107_v2 = vadd.f32 %v1091_v60, %v1073_v0  ;;  %v588_v3 = vpop.f32.mrb[9].mxu1 }
 0x179   : > { %v1095_v1 = vpop.f32.mrb[12].mxu0  ;;  %v1108_v5 = vadd.f32 %v721_v61, %v588_v3  ;;  %v1074_v6 = vpop.f32.mrb[10].mxu1 }
 0x17a   : > { %v737_v4 = vpop.f32.mrb[13].mxu0  ;;  %v784_v8 = vadd.f32 %v1107_v2, %v1682_v32  ;;  %v1109_v9 = vadd.f32 %v1092_v62, %v1074_v6  ;;  %v591_v10 = vpop.f32.mrb[11].mxu1 }
 0x17b   : > { %v1096_v7 = vpop.f32.mrb[14].mxu0  ;;  %v782_v12 = vadd.f32 %v1108_v5, %v1682_v32  ;;  %v1110_v13 = vadd.f32 %v724_v63, %v591_v10 }
 0x17c   : > { %v740_v11 = vpop.f32.mrb[15].mxu0  ;;  %800 = vst.msk [vmem:[%s1686_s27 + $0x50] sm:$0xff] %vm262_vm0, %v784_v8  ;;  %v785_v14 = vadd.f32 %v1109_v9, %v1682_v32 }
 0x17d   : > { %798 = vst.msk [vmem:[%s1686_s27 + $0x40] sm:$0xff] %vm262_vm0, %v782_v12  ;;  %v783_v15 = vadd.f32 %v1110_v13, %v1682_v32 }
 0x17e   : > { %801 = vst.msk [vmem:[%s1686_s27 + $0x58] sm:$0xff] %vm262_vm0, %v785_v14 }
 0x17f   : > { %799 = vst.msk [vmem:[%s1686_s27 + $0x48] sm:$0xff] %vm262_vm0, %v783_v15  ;;  %v1077_v16 = vpop.f32.mrb[12].mxu1 }
 0x180   : > { %v1111_v17 = vadd.f32 %v1095_v1, %v1077_v16  ;;  %v604_v18 = vpop.f32.mrb[13].mxu1 }
 0x181   : > { %v1112_v19 = vadd.f32 %v737_v4, %v604_v18  ;;  %v1078_v20 = vpop.f32.mrb[14].mxu1 }
 0x182   : > { %v788_v21 = vadd.f32 %v1111_v17, %v1682_v32  ;;  %v1113_v22 = vadd.f32 %v1096_v7, %v1078_v20  ;;  %v607_v23 = vpop.f32.mrb[15].mxu1 }
 0x183   : > { %v786_v24 = vadd.f32 %v1112_v19, %v1682_v32  ;;  %v1114_v25 = vadd.f32 %v740_v11, %v607_v23 }
 0x184   : > { %804 = vst.msk [vmem:[%s1686_s27 + $0x70] sm:$0xff] %vm262_vm0, %v788_v21  ;;  %v789_v26 = vadd.f32 %v1113_v22, %v1682_v32 }
 0x185   : > { %802 = vst.msk [vmem:[%s1686_s27 + $0x60] sm:$0xff] %vm262_vm0, %v786_v24  ;;  %v787_v27 = vadd.f32 %v1114_v25, %v1682_v32 }
 0x186   : > { %805 = vst.msk [vmem:[%s1686_s27 + $0x78] sm:$0xff] %vm262_vm0, %v789_v26 }
 0x187   : > { %803 = vst.msk [vmem:[%s1686_s27 + $0x68] sm:$0xff] %vm262_vm0, %v787_v27 }
 0x188   : > { %s1011_s7 = sshll.u32 %s1379_s15, 2  ;;  %s1012_s21 = sshll.u32 %s1383_s16, 5 }
 0x189   : > { %s819_s20 = sadd.s32 %s1012_s21, %s1011_s7  ;;  %s838_s9 = sshll.u32 %s1686_s27, 4  ;;  %s839_s9 = int_to_ptr.vmem [resolvable:$true] %s838_s9 }
 0x18a   : > { %s1013_s5 = sshll.u32 %s819_s20, 7  ;;  %s1407_s30 = smov 512  }
 0x18b   : > { %s821_s25 = scalar_lea.hbm %s1786_s3, %s1013_s5  ;;  %p1811_p8 = scmp.ne.s32.totalorder %s1801_s29, 0 }
 0x18c   : > { %s1408_s8 = smov 1024   ;;  %s1409_s11 = smov 4  }
 0x18d   : > { %1152 = sst [smem:[#allocation13]] (%p1811_p8), %s1407_s30  ;;  %s1410_s15 = smov 128  }
 0x18e   : > { %1153 = sst [smem:[#allocation13 + $0x1]] (%p1811_p8), %s1408_s8  ;;  %s1411_s16 = smov 8  }
 0x18f   : > { %1154 = sst [smem:[#allocation13 + $0x2]] (%p1811_p8), %s1409_s11  ;;  %s1412_s22 = smov [#allocation12]  }
 0x190   : > { %1155 = sst [smem:[#allocation13 + $0x3]] (%p1811_p8), %s1410_s15  ;;  %s1413_s4 = smov 0  }
 0x191   : > { %1156 = sst [smem:[#allocation13 + $0x4]] (%p1811_p8), %s1410_s15 }
 0x192   : > { %1157 = sst [smem:[#allocation13 + $0x5]] (%p1811_p8), %s1411_s16 }
 0x193   : > { %1158 = dma.general (%p1811_p8), %s839_s9, 2048, %s821_s25, %s807_s28, %s1412_s22, [#allocation13], %s1413_s4, 0  }
 0x194 PF: > { %s1812_s6 = sld [smem:[#allocation20_spill]]  ;;  %p1175_p9 = scmp.ge.s32.totalorder %s1395_s19, 2 }
 0x195   : > { %s866_s24 = sand.u32 1, %s1367_s12  }
 0x196   : > { %s867_s26 = scalar_lea.sflag [#allocation5], %s866_s24 }
 0x19a   : > { %p1813_p2 = scmp.ne.s32.totalorder %s1812_s6, 0 }
 0x19c   : > { %p1168_p5 = pnand %p1175_p9, %p1813_p2 }
 0x19e   : > { %1362 = dma.done.wait (!%p1168_p5), %s867_s26, 2048  }
 0x19f   : > { %1364 = vsyncadd (!%p1168_p5), %s867_s26, 4294965248  ;;  %s20_s19 = sadd.s32 1, %s1395_s19   ;;  %s1814_s27 = sld [smem:[#allocation21_spill]] }
 0x1a0   : > { %p17_p10 = scmp.ge.s32.totalorder %s20_s19, 6   ;;  %s1815_s29 = sld [smem:[#allocation18_spill]] }
 0x1a1   : > { %s1816_s28 = sld [smem:[#allocation19_spill]]  ;;  %s1817_s12 = smov %s1371_s13 }
 0x1a2   : > { %s1818_s13 = smov %s1375_s14  ;;  %s1820_s15 = smov %s1387_s17 }
 0x1a3   : > { %s1821_s16 = smov %s1391_s18  ;;  %19 = sbr.rel (!%p17_p10) target bundleno = 8 (0x8), region = 99 }
 0x1a5   : > { %s1819_s14 = smov %s1814_s27 }
 0x1a6   : > { %s1822_s17 = smov %s1815_s29 }
 0x1a7   : > { %s1823_s18 = smov %s1816_s28 }
 0x1aa   :  { %872 = vsyncpa [#allocation4], 1 }
 0x1ab   :  { %874 = vsyncpa [#allocation4 + $0x1], 1 }
 0x1ac   :  { %875 = vsyncpa [#allocation7], 1 }
 0x1ad   :  { %876 = vsyncpa [#allocation5], 1 }
 0x1ae   :  { %878 = vsyncpa [#allocation5 + $0x1], 1 }

// kernel: pseudo3d_conv.2
= control target key start
LH: loop header
LB: loop body
LE: loop exit
PB: predicated region body
PF: predicated region fallthrough
CT: control target
= control target key end

     0   :  { %8 = vsyncpa [#allocation4], 0  ;;  %s4218_s0 = inlined_call_operand.hbm [shape: bf16[8,8,8,4], index: 0, kind: input, shape index: {}]   ;;  %s4219_s1 = inlined_call_operand.hbm [shape: bf16[9,4,8], index: 1, kind: input, shape index: {}]   ;;  %s4220_s2 = inlined_call_operand.hbm [shape: f32[1,8], index: 2, kind: input, shape index: {}]   ;;  %s4221_s3 = inlined_call_operand.hbm [shape: bf16[8,8,8,8], index: 3, kind: output, shape index: {}]  }
   0x1   :  { %10 = vsyncpa [#allocation4 + $0x1], 0 }
   0x2   :  { %11 = vsyncpa [#allocation7], 0 }
   0x3   :  { %12 = vsyncpa [#allocation5], 0 }
   0x4   :  { %14 = vsyncpa [#allocation5 + $0x1], 0  ;;  %s3607_s12 = smov 0   ;;  %s3609_s13 = smov 0  }
   0x5   :  { %s3611_s14 = smov 0   ;;  %s3613_s15 = smov 0  }
   0x6   :  { %s3615_s16 = smov 0   ;;  %s3617_s17 = smov 0  }
   0x7 LB: > { %s2686_s18 = sadd.s32 4294967295, %s3574_s17   ;;  %s2687_s19 = sadd.s32 4294967294, %s3574_s17   ;;  %s3574_s17 = sphi %s3617_s17, %s20_s17   ;;  %s3570_s16 = sphi %s3615_s16, %s4247_s16   ;;  %s3566_s15 = sphi %s3613_s15, %s4246_s15   ;;  %s3562_s14 = sphi %s3611_s14, %s4245_s14   ;;  %s3558_s13 = sphi %s3609_s13, %s4244_s13   ;;  %s3554_s12 = sphi %s3607_s12, %s4243_s12  }
   0x8   : > { %p54_p0 = scmp.ne.s32.totalorder %s3558_s13, %s3554_s12  ;;  %p3641_p1 = scmp.eq.s32.totalorder %s2686_s18, 0 }
   0x9   : > { %p3645_p2 = scmp.eq.s32.totalorder %s2686_s18, 3  ;;  %p128_p3 = scmp.eq.s32.totalorder %s2687_s19, 3 }
   0xa   : > { %s4226_s20 = scalar_select %p3641_p1, 1, 0 }
   0xb   : > { %s4227_s21 = scalar_select %p3645_p2, 1, 0 }
   0xc   : > { %p3651_p4 = por %p3641_p1, %p54_p0  ;;  %p2688_p5 = scmp.ge.s32.totalorder %s3574_s17, 1 }
   0xd   : > { %p3656_p6 = por %p128_p3, %p54_p0  ;;  %p135_p7 = scmp.lt.s32.totalorder %s3574_s17, 5 }
   0xe   : > { %s4228_s22 = scalar_select %p3651_p4, 1, 0 }
   0xf   : > { %s4229_s23 = scalar_select %p3656_p6, 1, 0 }
  0x10   : > { %p3661_p8 = pnand %p2688_p5, %p135_p7  ;;  %s3576_s25 = smov [#allocation6]  }
  0x11   : > { %s147_s26 = sshll.u32 %s3576_s25, 4  ;;  %s3577_s28 = smov [#allocation8]   ;;  %s148_s26 = int_to_ptr.vmem [resolvable:$true] %s147_s26 }
  0x12   : > { %s4230_s24 = scalar_select %p3661_p8, 1, 0 }
  0x13   : > { %p3251_p9 = pneg %p3661_p8  ;;  %s161_s29 = sshll.u32 %s3577_s28, 4  ;;  %s3673_s29 = int_to_ptr.vmem [resolvable:$true] %s161_s29 }
  0x14   : > { %s3402_s5 = scalar_lea.hbm %s4219_s1, 288 }
  0x15   : > { %p3669_p10 = pnand %p3251_p9, %p3641_p1  ;;  %p3403_p11 = scmp.ne.s32.totalorder %s4219_s1, %s3402_s5 }
  0x16   : > { %p3409_p3 = scmp.lt.u32.totalorder %s3402_s5, %s4219_s1 }
  0x17   : > { %p3404_p12 = pneg %p3669_p10 }
  0x19   : > { %p3405_p13 = pnand %p3404_p12, %p3403_p11 }
  0x1b   : > { %p3406_p0 = pneg %p3405_p13 }
  0x1d   : > { %p3411_p5 = pnand %p3409_p3, %p3406_p0 }
  0x1f   : > { %3414 = shalt.err (!%p3411_p5)
}
  0x20   : > { %s3415_s10 = scalar_lea.vmem %s148_s26, 288  ;;  %p3423_p1 = scmp.lt.s32.totalorder %s148_s26, %s148_s26 }
  0x21   : > { %p3416_p7 = scmp.ne.s32.totalorder %s148_s26, %s3415_s10  ;;  %p3424_p4 = scmp.lt.s32.totalorder %s3415_s10, %s3415_s10 }
  0x23   : > { %p3418_p9 = pnand %p3416_p7, %p3404_p12  ;;  %p3425_p8 = por %p3424_p4, %p3423_p1 }
  0x25   : > { %p3419_p6 = pneg %p3418_p9 }
  0x27   : > { %p3426_p2 = pnand %p3425_p8, %p3419_p6 }
  0x29   : > { %3429 = shalt.err (!%p3426_p2)
}
  0x2a   : > { %s3578_s11 = smov 32   ;;  %s3579_s18 = smov 2  }
  0x2b   : > { %3254 = dma.hbm_to_vmem [thread:$0]  (!%p3669_p10), %s4219_s1, 288, %s148_s26, [#allocation7], %s3578_s11, %s3578_s11, %s3579_s18  }
  0x2c   : > { %s3430_s4 = scalar_lea.hbm %s4220_s2, 16 }
  0x2d   : > { %p3431_p11 = scmp.ne.s32.totalorder %s4220_s2, %s3430_s4  ;;  %p3437_p4 = scmp.lt.u32.totalorder %s3430_s4, %s4220_s2 }
  0x2f   : > { %p3433_p1 = pnand %p3431_p11, %p3404_p12 }
  0x31   : > { %p3434_p2 = pneg %p3433_p1 }
  0x33   : > { %p3439_p6 = pnand %p3437_p4, %p3434_p2 }
  0x35   : > { %3442 = shalt.err (!%p3439_p6)
}
  0x36   : > { %s3443_s26 = scalar_lea.vmem %s3673_s29, 16  ;;  %s3450_s9 = scalar_lea.vmem %s3673_s29, 32 }
  0x37   : > { %p3444_p8 = scmp.ne.s32.totalorder %s3673_s29, %s3443_s26  ;;  %p3451_p3 = scmp.lt.s32.totalorder %s3673_s29, %s3673_s29 }
  0x38   : > { %p3452_p5 = scmp.lt.s32.totalorder %s3450_s9, %s3443_s26 }
  0x39   : > { %p3446_p13 = pnand %p3444_p8, %p3404_p12 }
  0x3a   : > { %p3453_p7 = por %p3452_p5, %p3451_p3 }
  0x3b   : > { %p3447_p0 = pneg %p3446_p13 }
  0x3d   : > { %p3454_p9 = pnand %p3453_p7, %p3447_p0 }
  0x3f   : > { %3457 = shalt.err (!%p3454_p9)
}
  0x40   : > { %3257 = dma.hbm_to_vmem [thread:$0]  (!%p3669_p10), %s4220_s2, 16, %s3673_s29, [#allocation7]  }
  0x41   : > { %s32_s18 = sadd.s32 1, %s3570_s16  ;;  %s41_s19 = sadd.s32 1, %s3562_s14 }
  0x42   : > { %p34_p12 = scmp.ge.s32.totalorder %s32_s18, 4  ;;  %p48_p11 = scmp.ne.s32.totalorder %s3562_s14, %s3558_s13 }
  0x43   : > { %p49_p1 = scmp.eq.s32.totalorder %s3574_s17, 0  ;;  %p3268_p2 = scmp.lt.s32.totalorder %s3574_s17, 4 }
  0x44   : > { %s4249_s18 = smov (%p34_p12, %s32_s18), 0  ;;  %p4232_p6 = scmp.ne.s32.totalorder %s4227_s21, 0 }
  0x45   : > { %p50_p4 = por %p49_p1, %p48_p11  ;;  %s36_s25 = ssub.s32 %s3570_s16, %s4249_s18 }
  0x46   : > { %p3733_p8 = por %p4232_p6, %p48_p11  ;;  %s172_s28 = sand.u32 1, %s3562_s14  }
  0x47   : > { %p39_p13 = scmp.eq.s32.totalorder %s36_s25, 0  ;;  %s2692_s29 = sshll.u32 %s172_s28, 6 }
  0x48   : > { %s2853_s30 = sshll.u32 %s3570_s16, 10  ;;  %s176_s21 = scalar_lea.vmem [#allocation3], %s2692_s29 }
  0x49   : > { %s3742_s4 = scalar_select %p39_p13, %s3562_s14, %s41_s19  }
  0x4a   : > { %s3747_s7 = scalar_lea.hbm %s4218_s0, %s2853_s30  ;;  %s185_s8 = sshll.u32 %s176_s21, 4  ;;  %s3755_s8 = int_to_ptr.vmem [resolvable:$true] %s185_s8 }
  0x4b   : > { %p3751_p10 = pnand %p3268_p2, %p50_p4  ;;  %s3757_s9 = scalar_lea.sflag [#allocation4], %s172_s28 }
  0x4c   : > { %s3458_s10 = scalar_lea.hbm %s3747_s7, 1024  ;;  %s3463_s25 = scalar_lea.hbm %s4218_s0, 4096 }
  0x4d   : > { %p3459_p0 = scmp.ne.s32.totalorder %s3747_s7, %s3458_s10  ;;  %p3460_p3 = pneg %p3751_p10 }
  0x4e   : > { %p3464_p9 = scmp.lt.u32.totalorder %s3747_s7, %s4218_s0  ;;  %p3465_p12 = scmp.lt.u32.totalorder %s3463_s25, %s3458_s10 }
  0x4f   : > { %p3461_p5 = pnand %p3460_p3, %p3459_p0  ;;  %p3467_p1 = scmp.lt.u32.totalorder %s3458_s10, %s3747_s7 }
  0x50   : > { %p3466_p11 = por %p3465_p12, %p3464_p9 }
  0x51   : > { %p3462_p7 = pneg %p3461_p5 }
  0x52   : > { %p3468_p2 = por %p3467_p1, %p3466_p11 }
  0x54   : > { %p3469_p4 = pnand %p3468_p2, %p3462_p7 }
  0x56   : > { %3472 = shalt.err (!%p3469_p4)
}
  0x57   : > { %s3473_s28 = scalar_lea.vmem %s3755_s8, 1024  ;;  %s3580_s5 = smov [#allocation3]  }
  0x58   : > { %p3474_p6 = scmp.ne.s32.totalorder %s3755_s8, %s3473_s28  ;;  %s3478_s6 = sshll.u32 %s3580_s5, 4  ;;  %s3479_s6 = int_to_ptr.vmem [resolvable:$false] %s3478_s6 }
  0x59   : > { %s3480_s21 = scalar_lea.vmem %s3479_s6, 2048  ;;  %p3481_p5 = scmp.lt.s32.totalorder %s3755_s8, %s3479_s6 }
  0x5a   : > { %p3476_p13 = pnand %p3474_p6, %p3460_p3  ;;  %p3482_p9 = scmp.lt.s32.totalorder %s3480_s21, %s3473_s28 }
  0x5c   : > { %p3477_p0 = pneg %p3476_p13  ;;  %p3483_p12 = por %p3482_p9, %p3481_p5 }
  0x5e   : > { %p3484_p11 = pnand %p3483_p12, %p3477_p0 }
  0x60   : > { %3487 = shalt.err (!%p3484_p11)
}
  0x61   : > { %s3581_s10 = smov 64   ;;  %s3582_s11 = smov 4  }
  0x62   : > { %3261 = dma.hbm_to_vmem [thread:$0]  (!%p3751_p10), %s3747_s7, 1024, %s3755_s8, %s3757_s9, %s3581_s10, %s3581_s10, %s3582_s11  }
  0x63   : > { %p4235_p3 = scmp.ne.s32.totalorder %s4230_s24, 0 }
  0x64   : > { %s3788_s19 = sand.u32 (!%p4235_p3), 1, %s3558_s13   ;;  %p4236_p7 = scmp.ne.s32.totalorder (!%p4235_p3), %s4228_s22, 0 }
  0x65   : > { %197 = sbr.rel (%p4235_p3) target bundleno = 536 (0x218), region = 32  ;;  %s2697_s25 = sshll.u32 (!%p4235_p3), %s3788_s19, 6 }
  0x66   : > { %s200_s29 = scalar_lea.sflag (!%p4235_p3), [#allocation4], %s3788_s19  ;;  %s3794_s30 = scalar_lea.vmem (!%p4235_p3), [#allocation3], %s2697_s25 }
  0x6c   : > { %3541 = dma.done.wait (%p4236_p7), %s200_s29, 1024  }
  0x6d   : > { %3543 = vsyncadd (%p4236_p7), %s200_s29, 4294966272  ;;  %p4237_p10 = scmp.ne.s32.totalorder %s4226_s20, 0 }
  0x6f   : > { %3545 = dma.done.wait (%p4237_p10), [#allocation7], 304  }
  0x70   : > { %3547 = vsyncadd (%p4237_p10), [#allocation7], 4294966992  ;;  %vm237_vm0 = vcmask 27648   ;;  %v3583_v0 = vmov 0   ;;  %vm871_vm1 = vcmask 1041408   ;;  %vm846_vm3 = vcmask 31744  }
  0x71   : > { %455 = vst.msk [vmem:[#allocation2 + $0x50] sm:$0xf] %vm237_vm0, %v3583_v0  ;;  %456 = vst.msk [vmem:[#allocation2 + $0x54] sm:$0xf] %vm237_vm0, %v3583_v0  ;;  %v758_v1 = vld [vmem:[#allocation6 + $0x2] sm:$0x3] }
  0x72   : > { %238 = vst.msk [vmem:[#allocation2] sm:$0xf] %vm237_vm0, %v3583_v0  ;;  %239 = vst.msk [vmem:[#allocation2 + $0x4] sm:$0xf] %vm237_vm0, %v3583_v0  ;;  %v764_v2 = vld [vmem:[#allocation6 + $0x8] sm:$0x3]  ;;  %3229 = vmatprep.subr.msk.bf16.mxu1 %vm871_vm1, %v758_v1 }
  0x73   : > { %240 = vst.msk [vmem:[#allocation2 + $0x8] sm:$0xf] %vm237_vm0, %v3583_v0  ;;  %241 = vst.msk [vmem:[#allocation2 + $0xc] sm:$0xf] %vm237_vm0, %v3583_v0  ;;  %v475_v3 = vld [vmem:[%s3794_s30] sm:$0xf]  ;;  %3233 = vmatprep.subr.msk.bf16.mxu0 %vm871_vm1, %v764_v2 }
  0x74   : > { %242 = vst.msk [vmem:[#allocation2 + $0x10] sm:$0xf] %vm237_vm0, %v3583_v0  ;;  %243 = vst.msk [vmem:[#allocation2 + $0x14] sm:$0xf] %vm237_vm0, %v3583_v0  ;;  %v873_v4 = vsel %vm871_vm1, %v758_v1, 0  ;;  %v3869_v5 = vsel %vm871_vm1, %v764_v2, 0 }
  0x75   : > { %244 = vst.msk [vmem:[#allocation2 + $0x18] sm:$0xf] %vm237_vm0, %v3583_v0  ;;  %245 = vst.msk [vmem:[#allocation2 + $0x1c] sm:$0xf] %vm237_vm0, %v3583_v0  ;;  %v756_v6 = vld [vmem:[#allocation6] sm:$0x3]  ;;  %2938 = vmatpush3.bf16.msra.mxu1 %v873_v4  ;;  %3010 = vmatpush3.bf16.msra.mxu0 %v3869_v5 }
  0x76   : > { %246 = vst.msk [vmem:[#allocation2 + $0x20] sm:$0xf] %vm237_vm0, %v3583_v0  ;;  %247 = vst.msk [vmem:[#allocation2 + $0x24] sm:$0xf] %vm237_vm0, %v3583_v0  ;;  %v476_v7 = vld [vmem:[%s3794_s30 + $0x4] sm:$0xf]  ;;  %3230 = vmatprep.subr.msk.bf16.mxu1 %vm871_vm1, %v756_v6 }
  0x77   : > { %248 = vst.msk [vmem:[#allocation2 + $0x28] sm:$0xf] %vm237_vm0, %v3583_v0  ;;  %249 = vst.msk [vmem:[#allocation2 + $0x2c] sm:$0xf] %vm237_vm0, %v3583_v0  ;;  %v766_v8 = vld [vmem:[#allocation6 + $0xa] sm:$0x3] }
  0x78   : > { %250 = vst.msk [vmem:[#allocation2 + $0x30] sm:$0xf] %vm237_vm0, %v3583_v0  ;;  %251 = vst.msk [vmem:[#allocation2 + $0x34] sm:$0xf] %vm237_vm0, %v3583_v0  ;;  %v477_v9 = vld [vmem:[%s3794_s30 + $0x8] sm:$0xf]  ;;  %3235 = vmatprep.subr.msk.bf16.mxu0 %vm871_vm1, %v766_v8 }
  0x79   : > { %252 = vst.msk [vmem:[#allocation2 + $0x38] sm:$0xf] %vm237_vm0, %v3583_v0  ;;  %253 = vst.msk [vmem:[#allocation2 + $0x3c] sm:$0xf] %vm237_vm0, %v3583_v0  ;;  %v478_v10 = vld [vmem:[%s3794_s30 + $0xc] sm:$0xf] }
  0x7a   : > { %254 = vst.msk [vmem:[#allocation2 + $0x40] sm:$0xf] %vm237_vm0, %v3583_v0  ;;  %255 = vst.msk [vmem:[#allocation2 + $0x44] sm:$0xf] %vm237_vm0, %v3583_v0  ;;  %v479_v11 = vld [vmem:[%s3794_s30 + $0x10] sm:$0xf] }
  0x7b   : > { %256 = vst.msk [vmem:[#allocation2 + $0x48] sm:$0xf] %vm237_vm0, %v3583_v0  ;;  %257 = vst.msk [vmem:[#allocation2 + $0x4c] sm:$0xf] %vm237_vm0, %v3583_v0  ;;  %v480_v12 = vld [vmem:[%s3794_s30 + $0x14] sm:$0xf] }
  0x7c   : > { %457 = vst.msk [vmem:[#allocation2 + $0x58] sm:$0xf] %vm237_vm0, %v3583_v0  ;;  %458 = vst.msk [vmem:[#allocation2 + $0x5c] sm:$0xf] %vm237_vm0, %v3583_v0  ;;  %v481_v13 = vld [vmem:[%s3794_s30 + $0x18] sm:$0xf] }
  0x7d   : > { %459 = vst.msk [vmem:[#allocation2 + $0x60] sm:$0xf] %vm237_vm0, %v3583_v0  ;;  %460 = vst.msk [vmem:[#allocation2 + $0x64] sm:$0xf] %vm237_vm0, %v3583_v0  ;;  %v482_v14 = vld [vmem:[%s3794_s30 + $0x1c] sm:$0xf] }
  0x7e   : > { %461 = vst.msk [vmem:[#allocation2 + $0x68] sm:$0xf] %vm237_vm0, %v3583_v0  ;;  %462 = vst.msk [vmem:[#allocation2 + $0x6c] sm:$0xf] %vm237_vm0, %v3583_v0  ;;  %v483_v15 = vld [vmem:[%s3794_s30 + $0x20] sm:$0xf] }
  0x7f   : > { %463 = vst.msk [vmem:[#allocation2 + $0x70] sm:$0xf] %vm237_vm0, %v3583_v0  ;;  %464 = vst.msk [vmem:[#allocation2 + $0x74] sm:$0xf] %vm237_vm0, %v3583_v0  ;;  %v529_v16 = vld [vmem:[%s3794_s30] sm:$0xf] }
  0x80   : > { %465 = vst.msk [vmem:[#allocation2 + $0x78] sm:$0xf] %vm237_vm0, %v3583_v0  ;;  %466 = vst.msk [vmem:[#allocation2 + $0x7c] sm:$0xf] %vm237_vm0, %v3583_v0  ;;  %v530_v17 = vld [vmem:[%s3794_s30 + $0x4] sm:$0xf] }
  0x81   : > { %467 = vst.msk [vmem:[#allocation2 + $0x80] sm:$0xf] %vm237_vm0, %v3583_v0  ;;  %468 = vst.msk [vmem:[#allocation2 + $0x84] sm:$0xf] %vm237_vm0, %v3583_v0  ;;  %v546_v18 = vshrl.u32 %v529_v16, 16  ;;  %v549_v19 = vshll.u32 %v529_v16, 16 }
  0x82   : > { %469 = vst.msk [vmem:[#allocation2 + $0x88] sm:$0xf] %vm237_vm0, %v3583_v0  ;;  %470 = vst.msk [vmem:[#allocation2 + $0x8c] sm:$0xf] %vm237_vm0, %v3583_v0  ;;  %vm706_vm2 = vsmask.f32 3328 }
  0x83   : > { %471 = vst.msk [vmem:[#allocation2 + $0x90] sm:$0xf] %vm237_vm0, %v3583_v0  ;;  %472 = vst.msk [vmem:[#allocation2 + $0x94] sm:$0xf] %vm237_vm0, %v3583_v0  ;;  %v555_v20 = vshrl.u32 %v530_v17, 16  ;;  %v558_v21 = vshll.u32 %v530_v17, 16 }
  0x84   : > { %473 = vst.msk [vmem:[#allocation2 + $0x98] sm:$0xf] %vm237_vm0, %v3583_v0  ;;  %474 = vst.msk [vmem:[#allocation2 + $0x9c] sm:$0xf] %vm237_vm0, %v3583_v0  ;;  %v548_v23 = vrot.slane %v546_v18, 4  ;;  %v551_v24 = vrot.slane %v549_v19, 5 }
  0x85   : > { %509 = vst.msk [vmem:[#allocation2 + $0xa0] sm:$0xf] %vm237_vm0, %v3583_v0  ;;  %510 = vst.msk [vmem:[#allocation2 + $0xa4] sm:$0xf] %vm237_vm0, %v3583_v0  ;;  %v557_v25 = vrot.slane %v555_v20, 4  ;;  %v560_v26 = vrot.slane %v558_v21, 5 }
  0x86   : > { %511 = vst.msk [vmem:[#allocation2 + $0xa8] sm:$0xf] %vm237_vm0, %v3583_v0  ;;  %512 = vst.msk [vmem:[#allocation2 + $0xac] sm:$0xf] %vm237_vm0, %v3583_v0  ;;  %v484_v28 = vld [vmem:[%s3794_s30 + $0x24] sm:$0xf]  ;;  %v552_v33 = vor.u32 %v551_v24, %v548_v23 }
  0x87   : > { %513 = vst.msk [vmem:[#allocation2 + $0xb0] sm:$0xf] %vm237_vm0, %v3583_v0  ;;  %514 = vst.msk [vmem:[#allocation2 + $0xb4] sm:$0xf] %vm237_vm0, %v3583_v0  ;;  %v1037_v32 = vsel %vm871_vm1, %v756_v6, 0  ;;  %v561_v34 = vor.u32 %v560_v26, %v557_v25  ;;  %v1805_v38 = vsel %vm871_vm1, %v766_v8, 0 }
  0x88   : > { %515 = vst.msk [vmem:[#allocation2 + $0xb8] sm:$0xf] %vm237_vm0, %v3583_v0  ;;  %516 = vst.msk [vmem:[#allocation2 + $0xbc] sm:$0xf] %vm237_vm0, %v3583_v0  ;;  %v768_v36 = vld [vmem:[#allocation6 + $0xc] sm:$0x3] }
  0x89   : > { %517 = vst.msk [vmem:[#allocation2 + $0xc0] sm:$0xf] %vm237_vm0, %v3583_v0  ;;  %518 = vst.msk [vmem:[#allocation2 + $0xc4] sm:$0xf] %vm237_vm0, %v3583_v0  ;;  %v553_v40 = vrot.slane %v552_v33, 4  ;;  %v562_v42 = vrot.slane %v561_v34, 4 }
  0x8a   : > { %519 = vst.msk [vmem:[#allocation2 + $0xc8] sm:$0xf] %vm237_vm0, %v3583_v0  ;;  %520 = vst.msk [vmem:[#allocation2 + $0xcc] sm:$0xf] %vm237_vm0, %v3583_v0  ;;  %v485_v47 = vld [vmem:[%s3794_s30 + $0x28] sm:$0xf] }
  0x8b   : > { %521 = vst.msk [vmem:[#allocation2 + $0xd0] sm:$0xf] %vm237_vm0, %v3583_v0  ;;  %522 = vst.msk [vmem:[#allocation2 + $0xd4] sm:$0xf] %vm237_vm0, %v3583_v0  ;;  %v531_v49 = vld [vmem:[%s3794_s30 + $0x8] sm:$0xf] }
  0x8c   : > { %523 = vst.msk [vmem:[#allocation2 + $0xd8] sm:$0xf] %vm237_vm0, %v3583_v0  ;;  %524 = vst.msk [vmem:[#allocation2 + $0xdc] sm:$0xf] %vm237_vm0, %v3583_v0  ;;  %v708_v30 = vld [vmem:[#allocation2 + $0xa4] sm:$0xf] }
  0x8d   : > { %525 = vst.msk [vmem:[#allocation2 + $0xe0] sm:$0xf] %vm237_vm0, %v3583_v0  ;;  %526 = vst.msk [vmem:[#allocation2 + $0xe4] sm:$0xf] %vm237_vm0, %v3583_v0  ;;  %v711_v35 = vld [vmem:[#allocation2 + $0xa8] sm:$0xf] }
  0x8e   : > { %527 = vst.msk [vmem:[#allocation2 + $0xe8] sm:$0xf] %vm237_vm0, %v3583_v0  ;;  %528 = vst.msk [vmem:[#allocation2 + $0xec] sm:$0xf] %vm237_vm0, %v3583_v0  ;;  %v532_v50 = vld [vmem:[%s3794_s30 + $0xc] sm:$0xf] }
  0x8f   : > { %492 = vst.msk [vmem:[#allocation2 + $0x54] sm:$0xf] %vm237_vm0, %v475_v3  ;;  %493 = vst.msk [vmem:[#allocation2 + $0x58] sm:$0xf] %vm237_vm0, %v476_v7  ;;  %v3918_v51 = vsel %vm871_vm1, %v768_v36, 0  ;;  %v564_v52 = vshrl.u32 %v531_v49, 16 }
  0x90   : > { %494 = vst.msk [vmem:[#allocation2 + $0x5c] sm:$0xf] %vm237_vm0, %v477_v9  ;;  %495 = vst.msk [vmem:[#allocation2 + $0x60] sm:$0xf] %vm237_vm0, %v478_v10  ;;  %v567_v53 = vshll.u32 %v531_v49, 16  ;;  %v573_v54 = vshrl.u32 %v532_v50, 16 }
  0x91   : > { %496 = vst.msk [vmem:[#allocation2 + $0x64] sm:$0xf] %vm237_vm0, %v479_v11  ;;  %497 = vst.msk [vmem:[#allocation2 + $0x68] sm:$0xf] %vm237_vm0, %v480_v12  ;;  %v576_v55 = vshll.u32 %v532_v50, 16  ;;  %v566_v59 = vrot.slane %v564_v52, 4 }
  0x92   : > { %498 = vst.msk [vmem:[#allocation2 + $0x6c] sm:$0xf] %vm237_vm0, %v481_v13  ;;  %499 = vst.msk [vmem:[#allocation2 + $0x70] sm:$0xf] %vm237_vm0, %v482_v14  ;;  %v486_v56 = vld [vmem:[%s3794_s30 + $0x2c] sm:$0xf] }
  0x93   : > { %500 = vst.msk [vmem:[#allocation2 + $0x7c] sm:$0xf] %vm237_vm0, %v483_v15  ;;  %vm3894_vm4 = vmand %vm237_vm0, %vm706_vm2  ;;  %v487_v57 = vld [vmem:[%s3794_s30 + $0x30] sm:$0xf]  ;;  %v569_v60 = vrot.slane %v567_v53, 5  ;;  %v575_v61 = vrot.slane %v573_v54, 4 }
  0x94   : > { %501 = vst.msk [vmem:[#allocation2 + $0x80] sm:$0xf] %vm237_vm0, %v484_v28  ;;  %v709_v43 = vsel %vm3894_vm4, %v553_v40, %v708_v30  ;;  %v712_v45 = vsel %vm3894_vm4, %v562_v42, %v711_v35  ;;  %502 = vst.msk [vmem:[#allocation2 + $0x84] sm:$0xf] %vm237_vm0, %v485_v47  ;;  %v533_v58 = vld [vmem:[%s3794_s30 + $0x10] sm:$0xf] }
  0x95   : > { %710 = vst [vmem:[#allocation2 + $0xa4] sm:$0xf] %v709_v43  ;;  %713 = vst [vmem:[#allocation2 + $0xa8] sm:$0xf] %v712_v45  ;;  %v578_v62 = vrot.slane %v576_v55, 5  ;;  %v582_v1 = vshrl.u32 %v533_v58, 16  ;;  %v570_v6 = vor.u32 %v569_v60, %v566_v59 }
  0x96   : > { %v3329_v22 = vld [vmem:[#allocation2 + $0x50] sm:$0xff]   ;;  %503 = vst.msk [vmem:[#allocation2 + $0x88] sm:$0xf] %vm237_vm0, %v486_v56  ;;  %504 = vst.msk [vmem:[#allocation2 + $0x8c] sm:$0xf] %vm237_vm0, %v487_v57  ;;  %v585_v2 = vshll.u32 %v533_v58, 16 }
  0x97   : > { %2939 = vmatprep.mubr.msk.bf16.mxu1 %vm846_vm3, %v3329_v22  ;;  %v3330_v29 = vld [vmem:[#allocation2 + $0x54] sm:$0xff]   ;;  %v3332_v37 = vld [vmem:[#allocation2 + $0x5c] sm:$0xff]   ;;  %v534_v63 = vld [vmem:[%s3794_s30 + $0x14] sm:$0xf]  ;;  %vm404_vm5 = vsmask.f32 7938  ;;  %v579_v7 = vor.u32 %v578_v62, %v575_v61 }
  0x98   : > { %v3331_v31 = vld [vmem:[#allocation2 + $0x58] sm:$0xff]   ;;  %3011 = vmatprep.mubr.msk.bf16.mxu0 %vm846_vm3, %v3330_v29  ;;  %v3333_v39 = vld [vmem:[#allocation2 + $0x60] sm:$0xff]   ;;  %v714_v0 = vld [vmem:[#allocation2 + $0xac] sm:$0xf]  ;;  %v591_v3 = vshrl.u32 %v534_v63, 16  ;;  %v594_v4 = vshll.u32 %v534_v63, 16 }
  0x99   : > { %2940 = vmatmul.mubr.msk.bf16.vlgmr.msra.gmra.mrb[0].mxu1 %vm846_vm3, %v3331_v31  ;;  %3012 = vmatmul.mubr.msk.bf16.vlgmr.msra.gmra.mrb[0].mxu0 %vm846_vm3, %v3332_v37  ;;  %v3334_v41 = vld [vmem:[#allocation2 + $0x64] sm:$0xff]   ;;  %v3336_v46 = vld [vmem:[#allocation2 + $0x6c] sm:$0xff]   ;;  %v584_v11 = vrot.slane %v582_v1, 4  ;;  %v587_v12 = vrot.slane %v585_v2, 5  ;;  %v571_v15 = vrot.slane %v570_v6, 4  ;;  %v580_v16 = vrot.slane %v579_v7, 4  ;;  %vm3952_vm6 = vmand %vm237_vm0, %vm404_vm5 }
  0x9a   : > { %2956 = vmatpush3.bf16.msra.mxu1 %v1037_v32  ;;  %3028 = vmatpush3.bf16.msra.mxu0 %v1805_v38  ;;  %v3335_v44 = vld [vmem:[#allocation2 + $0x68] sm:$0xff]   ;;  %v3337_v48 = vld [vmem:[#allocation2 + $0x78] sm:$0xff]   ;;  %v717_v8 = vld [vmem:[#allocation2 + $0xb0] sm:$0xf]  ;;  %v593_v13 = vrot.slane %v591_v3, 4  ;;  %v596_v17 = vrot.slane %v594_v4, 5 }
  0x9b   : > { %2943 = vmatprep.mubr.msk.bf16.mxu1 %vm846_vm3, %v3333_v39  ;;  %3015 = vmatprep.mubr.msk.bf16.mxu0 %vm846_vm3, %v3334_v41  ;;  %v488_v9 = vld [vmem:[%s3794_s30 + $0x34] sm:$0xf]  ;;  %v588_v18 = vor.u32 %v587_v12, %v584_v11  ;;  %v489_v19 = vld [vmem:[%s3794_s30 + $0x38] sm:$0xf]  ;;  %v536_v21 = vld [vmem:[%s3794_s30 + $0x1c] sm:$0xf]  ;;  %v715_v22 = vsel %vm3894_vm4, %v571_v15, %v714_v0  ;;  %v718_v23 = vsel %vm3894_vm4, %v580_v16, %v717_v8 }
  0x9c   : > { %3236 = vmatprep.subr.msk.bf16.mxu0 %vm871_vm1, %v768_v36  ;;  %v3338_v10 = vld [vmem:[#allocation2 + $0xa4] sm:$0xff]   ;;  %505 = vst.msk [vmem:[#allocation2 + $0x90] sm:$0xf] %vm237_vm0, %v488_v9  ;;  %v597_v24 = vor.u32 %v596_v17, %v593_v13  ;;  %v720_v25 = vld [vmem:[#allocation2 + $0xb4] sm:$0xf]  ;;  %v609_v34 = vshrl.u32 %v536_v21, 16 }
  0x9d   : > { %v3339_v14 = vld [vmem:[#allocation2 + $0x80] sm:$0xff]   ;;  %v535_v20 = vld [vmem:[%s3794_s30 + $0x18] sm:$0xf]  ;;  %v723_v26 = vld [vmem:[#allocation2 + $0xb8] sm:$0xf]  ;;  %v589_v30 = vrot.slane %v588_v18, 4 }
  0x9e   : > { %506 = vst.msk [vmem:[#allocation2 + $0x94] sm:$0xf] %vm237_vm0, %v489_v19  ;;  %v600_v28 = vshrl.u32 %v535_v20, 16  ;;  %716 = vst [vmem:[#allocation2 + $0xac] sm:$0xf] %v715_v22  ;;  %v3341_v29 = vld [vmem:[#allocation2 + $0x88] sm:$0xff]  }
  0x9f   : > { %719 = vst [vmem:[#allocation2 + $0xb0] sm:$0xf] %v718_v23  ;;  %v598_v31 = vrot.slane %v597_v24, 4  ;;  %v603_v33 = vshll.u32 %v535_v20, 16  ;;  %v258_v35 = vld [vmem:[%s3794_s30] sm:$0xf]  ;;  %v721_v36 = vsel %vm3894_vm4, %v589_v30, %v720_v25 }
  0xa0   : > { %v602_v32 = vrot.slane %v600_v28, 4  ;;  %v612_v37 = vshll.u32 %v536_v21, 16  ;;  %v275_v38 = vshrl.u32 %v258_v35, 16  ;;  %v278_v39 = vshll.u32 %v258_v35, 16  ;;  %722 = vst [vmem:[#allocation2 + $0xb4] sm:$0xf] %v721_v36 }
  0xa1   : > { %2944 = vmatmul.mubr.msk.bf16.gmra.mrb[4].mxu1 %vm846_vm3, %v3335_v44  ;;  %3016 = vmatmul.mubr.msk.bf16.gmra.mrb[4].mxu0 %vm846_vm3, %v3336_v46  ;;  %v724_v40 = vsel %vm3894_vm4, %v598_v31, %v723_v26  ;;  %v605_v41 = vrot.slane %v603_v33, 5  ;;  %v611_v42 = vrot.slane %v609_v34, 4  ;;  %v726_v44 = vld [vmem:[#allocation2 + $0xbc] sm:$0xf]  ;;  %v3947_v46 = vld [vmem:[#allocation6 + $0x4] sm:$0x3] }
  0xa2   : > { %2947 = vmatprep.mubr.msk.bf16.mxu1 %vm846_vm3, %v3337_v48  ;;  %3029 = vmatprep.mubr.msk.bf16.mxu0 %vm846_vm3, %v3338_v10  ;;  %725 = vst [vmem:[#allocation2 + $0xb8] sm:$0xf] %v724_v40  ;;  %v614_v43 = vrot.slane %v612_v37, 5  ;;  %v277_v45 = vrot.slane %v275_v38, 7  ;;  %v537_v47 = vld [vmem:[%s3794_s30 + $0x20] sm:$0xf] }
  0xa3   : > { %v606_v48 = vor.u32 %v605_v41, %v602_v32  ;;  %v729_v49 = vld [vmem:[#allocation2 + $0xc0] sm:$0xf]  ;;  %v406_v52 = vld [vmem:[#allocation2 + $0x4] sm:$0xf]  ;;  %3231 = vmatprep.subr.msk.bf16.mxu1 %vm871_vm1, %v3947_v46  ;;  %v538_v53 = vld [vmem:[%s3794_s30 + $0x24] sm:$0xf] }
  0xa4   : > { %v618_v54 = vshrl.u32 %v537_v47, 16  ;;  %v621_v55 = vshll.u32 %v537_v47, 16  ;;  %v615_v57 = vor.u32 %v614_v43, %v611_v42  ;;  %v280_v58 = vor.u32 %v278_v39, %v277_v45  ;;  %v732_v7 = vld [vmem:[#allocation2 + $0xcc] sm:$0xf]  ;;  %v259_v8 = vld [vmem:[%s3794_s30 + $0x4] sm:$0xf] }
  0xa5   : > { %v3343_v56 = vld [vmem:[#allocation2 + $0x90] sm:$0xff]   ;;  %v627_v59 = vshrl.u32 %v538_v53, 16  ;;  %v630_v60 = vshll.u32 %v538_v53, 16  ;;  %v607_v62 = vrot.slane %v606_v48, 4  ;;  %v260_v9 = vld [vmem:[%s3794_s30 + $0x8] sm:$0xf] }
  0xa6   : > { %v3340_v61 = vld [vmem:[#allocation2 + $0xac] sm:$0xff]   ;;  %v616_v63 = vrot.slane %v615_v57, 4  ;;  %v407_v0 = vsel %vm3952_vm6, %v280_v58, %v406_v52  ;;  %v620_v1 = vrot.slane %v618_v54, 4  ;;  %v623_v2 = vrot.slane %v621_v55, 5  ;;  %v409_v21 = vld [vmem:[#allocation2 + $0x8] sm:$0xf] }
  0xa7   : > { %v727_v3 = vsel %vm3894_vm4, %v607_v62, %v726_v44  ;;  %408 = vst [vmem:[#allocation2 + $0x4] sm:$0xf] %v407_v0  ;;  %v629_v4 = vrot.slane %v627_v59, 4  ;;  %v632_v6 = vrot.slane %v630_v60, 5  ;;  %v735_v12 = vld [vmem:[#allocation2 + $0xd0] sm:$0xf] }
  0xa8   : > { %728 = vst [vmem:[#allocation2 + $0xbc] sm:$0xf] %v727_v3  ;;  %v730_v10 = vsel %vm3894_vm4, %v616_v63, %v729_v49  ;;  %v624_v11 = vor.u32 %v623_v2, %v620_v1  ;;  %v282_v13 = vshrl.u32 %v259_v8, 16  ;;  %v289_v17 = vshrl.u32 %v260_v9, 16  ;;  %v539_v22 = vld [vmem:[%s3794_s30 + $0x28] sm:$0xf] }
  0xa9   : > { %2948 = vmatmul.mubr.msk.bf16.gmra.mrb[8].mxu1 %vm846_vm3, %v3339_v14  ;;  %3030 = vmatmul.mubr.msk.bf16.vlgmr.msra.gmra.mrb[0].mxu0 %vm846_vm3, %v3340_v61  ;;  %v285_v14 = vshll.u32 %v259_v8, 16  ;;  %v3342_v15 = vld [vmem:[#allocation2 + $0xb4] sm:$0xff]   ;;  %731 = vst [vmem:[#allocation2 + $0xc0] sm:$0xf] %v730_v10  ;;  %v633_v16 = vor.u32 %v632_v6, %v629_v4  ;;  %v292_v18 = vshll.u32 %v260_v9, 16  ;;  %v636_v25 = vshrl.u32 %v539_v22, 16 }
  0xaa   : > { %2951 = vmatprep.mubr.msk.bf16.mxu1 %vm846_vm3, %v3341_v29  ;;  %3046 = vmatpush3.bf16.msra.mxu0 %v3918_v51  ;;  %v625_v19 = vrot.slane %v624_v11, 4  ;;  %v284_v20 = vrot.slane %v282_v13, 7  ;;  %v291_v23 = vrot.slane %v289_v17, 7  ;;  %v540_v24 = vld [vmem:[%s3794_s30 + $0x2c] sm:$0xf]  ;;  %v639_v26 = vshll.u32 %v539_v22, 16 }
  0xab   : > { %3033 = vmatprep.mubr.msk.bf16.mxu0 %vm846_vm3, %v3342_v15  ;;  %v634_v51 = vrot.slane %v633_v16, 4  ;;  %v412_v30 = vld [vmem:[#allocation2 + $0xc] sm:$0xf]  ;;  %v645_v31 = vshrl.u32 %v540_v24, 16  ;;  %v648_v32 = vshll.u32 %v540_v24, 16  ;;  %v638_v35 = vrot.slane %v636_v25, 4 }
  0xac   : > { %v733_v28 = vsel %vm3894_vm4, %v625_v19, %v732_v7  ;;  %v287_v29 = vor.u32 %v285_v14, %v284_v20  ;;  %v294_v34 = vor.u32 %v292_v18, %v291_v23  ;;  %v641_v36 = vrot.slane %v639_v26, 5  ;;  %v261_v37 = vld [vmem:[%s3794_s30 + $0xc] sm:$0xf]  ;;  %v262_v38 = vld [vmem:[%s3794_s30 + $0x10] sm:$0xf]  ;;  %s4117_s20 = scalar_lea.vmem [#allocation9], %s2697_s25 }
  0xad   : > { %734 = vst [vmem:[#allocation2 + $0xcc] sm:$0xf] %v733_v28  ;;  %v736_v33 = vsel %vm3894_vm4, %v634_v51, %v735_v12  ;;  %v647_v41 = vrot.slane %v645_v31, 4  ;;  %v650_v42 = vrot.slane %v648_v32, 5  ;;  %v738_v43 = vld [vmem:[#allocation2 + $0xd4] sm:$0xf] }
  0xae   : > { %v3345_v39 = vld [vmem:[#allocation2] sm:$0xff]   ;;  %737 = vst [vmem:[#allocation2 + $0xd0] sm:$0xf] %v736_v33  ;;  %v410_v40 = vsel %vm3952_vm6, %v287_v29, %v409_v21  ;;  %v296_v44 = vshrl.u32 %v261_v37, 16  ;;  %v413_v45 = vsel %vm3952_vm6, %v294_v34, %v412_v30  ;;  %v642_v47 = vor.u32 %v641_v36, %v638_v35  ;;  %v741_v48 = vld [vmem:[#allocation2 + $0xd8] sm:$0xf] }
  0xaf   : > { %411 = vst [vmem:[#allocation2 + $0x8] sm:$0xf] %v410_v40  ;;  %v299_v49 = vshll.u32 %v261_v37, 16  ;;  %v303_v52 = vshrl.u32 %v262_v38, 16  ;;  %v415_v53 = vld [vmem:[#allocation2 + $0x10] sm:$0xf]  ;;  %v651_v55 = vor.u32 %v650_v42, %v647_v41 }
  0xb0   : > { %v3344_v54 = vld [vmem:[#allocation2 + $0xbc] sm:$0xff]   ;;  %414 = vst [vmem:[#allocation2 + $0xc] sm:$0xf] %v413_v45  ;;  %v306_v57 = vshll.u32 %v262_v38, 16  ;;  %v643_v58 = vrot.slane %v642_v47, 4  ;;  %v1217_v19 = vsel %vm871_vm1, %v3947_v46, 0 }
  0xb1   : > { %2952 = vmatmul.mubr.msk.bf16.gmra.mrb[12].mxu1 %vm846_vm3, %v3343_v56  ;;  %v298_v56 = vrot.slane %v296_v44, 7  ;;  %v305_v59 = vrot.slane %v303_v52, 7  ;;  %v418_v60 = vld [vmem:[#allocation2 + $0x14] sm:$0xf]  ;;  %v541_v61 = vld [vmem:[%s3794_s30 + $0x30] sm:$0xf]  ;;  %3034 = vmatmul.mubr.msk.bf16.gmra.mrb[4].mxu0 %vm846_vm3, %v3344_v54 }
  0xb2   : > { %2957 = vmatprep.mubr.msk.bf16.mxu1 %vm846_vm3, %v3345_v39  ;;  %v652_v62 = vrot.slane %v651_v55, 4  ;;  %v542_v0 = vld [vmem:[%s3794_s30 + $0x34] sm:$0xf]  ;;  %v654_v1 = vshrl.u32 %v541_v61, 16  ;;  %v657_v2 = vshll.u32 %v541_v61, 16  ;;  %v739_v3 = vsel %vm3894_vm4, %v643_v58, %v738_v43  ;;  %v3367_v50 = vld [vmem:[#allocation2 + $0xb8] sm:$0xff]  }
  0xb3   : > { %v301_v63 = vor.u32 %v299_v49, %v298_v56  ;;  %v308_v4 = vor.u32 %v306_v57, %v305_v59  ;;  %v663_v6 = vshrl.u32 %v542_v0, 16  ;;  %v666_v7 = vshll.u32 %v542_v0, 16  ;;  %740 = vst [vmem:[#allocation2 + $0xd4] sm:$0xf] %v739_v3  ;;  %v263_v12 = vld [vmem:[%s3794_s30 + $0x14] sm:$0xf] }
  0xb4   : > { %v742_v8 = vsel %vm3894_vm4, %v652_v62, %v741_v48  ;;  %v656_v10 = vrot.slane %v654_v1, 4  ;;  %v659_v11 = vrot.slane %v657_v2, 5  ;;  %v744_v17 = vld [vmem:[#allocation2 + $0xdc] sm:$0xf]  ;;  %v310_v18 = vshrl.u32 %v263_v12, 16  ;;  %s2855_s22 = sshll.u32 %s3566_s15, 10 }
  0xb5   : > { %v416_v9 = vsel %vm3952_vm6, %v301_v63, %v415_v53  ;;  %v3346_v13 = vld [vmem:[#allocation2 + $0xcc] sm:$0xff]   ;;  %743 = vst [vmem:[#allocation2 + $0xd8] sm:$0xf] %v742_v8  ;;  %v419_v14 = vsel %vm3952_vm6, %v308_v4, %v418_v60  ;;  %v665_v15 = vrot.slane %v663_v6, 4  ;;  %v668_v16 = vrot.slane %v666_v7, 5  ;;  %s2582_s24 = sshll.u32 %s4117_s20, 4  ;;  %s4162_s26 = scalar_lea.hbm %s4221_s3, %s2855_s22  ;;  %s4164_s24 = int_to_ptr.vmem [resolvable:$true] %s2582_s24 }
  0xb6   : > { %417 = vst [vmem:[#allocation2 + $0x10] sm:$0xf] %v416_v9  ;;  %420 = vst [vmem:[#allocation2 + $0x14] sm:$0xf] %v419_v14  ;;  %v660_v20 = vor.u32 %v659_v11, %v656_v10  ;;  %v264_v21 = vld [vmem:[%s3794_s30 + $0x18] sm:$0xf]  ;;  %3037 = vmatprep.mubr.msk.bf16.mxu0 %vm846_vm3, %v3346_v13 }
  0xb7   : > { %v313_v22 = vshll.u32 %v263_v12, 16  ;;  %v3347_v51 = vld [vmem:[#allocation2 + $0x8] sm:$0xff]   ;;  %v669_v23 = vor.u32 %v668_v16, %v665_v15  ;;  %v312_v24 = vrot.slane %v310_v18, 7  ;;  %v317_v25 = vshrl.u32 %v264_v21, 16  ;;  %v747_v29 = vld [vmem:[#allocation2 + $0xe0] sm:$0xf] }
  0xb8   : > { %v320_v26 = vshll.u32 %v264_v21, 16  ;;  %v661_v28 = vrot.slane %v660_v20, 4  ;;  %v421_v30 = vld [vmem:[#allocation2 + $0x18] sm:$0xf]  ;;  %v543_v33 = vld [vmem:[%s3794_s30 + $0x38] sm:$0xf] }
  0xb9   : > { %2958 = vmatmul.mubr.msk.bf16.vlgmr.msra.gmra.mrb[0].mxu1 %vm846_vm3, %v3347_v51  ;;  %v670_v31 = vrot.slane %v669_v23, 4  ;;  %v315_v46 = vor.u32 %v313_v22, %v312_v24  ;;  %v319_v32 = vrot.slane %v317_v25, 7  ;;  %v544_v34 = vld [vmem:[%s3794_s30 + $0x3c] sm:$0xf]  ;;  %v424_v36 = vld [vmem:[#allocation2 + $0x1c] sm:$0xf] }
  0xba   : > { %2974 = vmatpush3.bf16.msra.mxu1 %v1217_v19  ;;  %v745_v35 = vsel %vm3894_vm4, %v661_v28, %v744_v17  ;;  %v672_v37 = vshrl.u32 %v543_v33, 16  ;;  %v675_v38 = vshll.u32 %v543_v33, 16  ;;  %v681_v39 = vshrl.u32 %v544_v34, 16  ;;  %v750_v54 = vld [vmem:[#allocation2 + $0xe4] sm:$0xf]  ;;  %v3354_v25 = vld [vmem:[#allocation2 + $0x8] sm:$0xff]  }
  0xbb   : > { %746 = vst [vmem:[#allocation2 + $0xdc] sm:$0xf] %v745_v35  ;;  %v748_v40 = vsel %vm3894_vm4, %v670_v31, %v747_v29  ;;  %v322_v41 = vor.u32 %v320_v26, %v319_v32  ;;  %v422_v42 = vsel %vm3952_vm6, %v315_v46, %v421_v30  ;;  %v684_v43 = vshll.u32 %v544_v34, 16  ;;  %v753_v55 = vld [vmem:[#allocation2 + $0xe8] sm:$0xf]  ;;  %s2567_s15 = scalar_lea.sflag [#allocation5], %s3788_s19 }
  0xbc   : > { %v3348_v44 = vld [vmem:[#allocation2 + $0xd4] sm:$0xff]   ;;  %749 = vst [vmem:[#allocation2 + $0xe0] sm:$0xf] %v748_v40  ;;  %423 = vst [vmem:[#allocation2 + $0x18] sm:$0xf] %v422_v42  ;;  %v674_v45 = vrot.slane %v672_v37, 4 }
  0xbd   : > { %v3349_v47 = vld [vmem:[#allocation2 + $0x10] sm:$0xff]   ;;  %v425_v48 = vsel %vm3952_vm6, %v322_v41, %v424_v36  ;;  %v677_v49 = vrot.slane %v675_v38, 5  ;;  %v683_v52 = vrot.slane %v681_v39, 4  ;;  %v686_v53 = vrot.slane %v684_v43, 5  ;;  %3038 = vmatmul.mubr.msk.bf16.gmra.mrb[8].mxu0 %vm846_vm3, %v3348_v44  ;;  %v4014_v61 = vld [vmem:[#allocation6 + $0xe] sm:$0x3] }
  0xbe   : > { %426 = vst [vmem:[#allocation2 + $0x1c] sm:$0xf] %v425_v48  ;;  %v266_v56 = vld [vmem:[%s3794_s30 + $0x20] sm:$0xf]  ;;  %2961 = vmatprep.mubr.msk.bf16.mxu1 %vm846_vm3, %v3349_v47  ;;  %v267_v62 = vld [vmem:[%s3794_s30 + $0x24] sm:$0xf]  ;;  %3237 = vmatprep.subr.msk.bf16.mxu0 %vm871_vm1, %v4014_v61 }
  0xbf   : > { %v678_v57 = vor.u32 %v677_v49, %v674_v45  ;;  %v687_v58 = vor.u32 %v686_v53, %v683_v52  ;;  %v331_v59 = vshrl.u32 %v266_v56, 16  ;;  %v334_v60 = vshll.u32 %v266_v56, 16  ;;  %v268_v63 = vld [vmem:[%s3794_s30 + $0x28] sm:$0xf]  ;;  %v430_v3 = vld [vmem:[#allocation2 + $0x2c] sm:$0xf] }
  0xc0   : > { %v338_v4 = vshrl.u32 %v267_v62, 16  ;;  %v341_v6 = vshll.u32 %v267_v62, 16  ;;  %v345_v7 = vshrl.u32 %v268_v63, 16  ;;  %v348_v8 = vshll.u32 %v268_v63, 16  ;;  %v433_v9 = vld [vmem:[#allocation2 + $0x30] sm:$0xf] }
  0xc1   : > { %v679_v0 = vrot.slane %v678_v57, 4  ;;  %v688_v1 = vrot.slane %v687_v58, 4  ;;  %v333_v2 = vrot.slane %v331_v59, 7  ;;  %v436_v16 = vld [vmem:[#allocation2 + $0x34] sm:$0xf]  ;;  %vm2549_vm7 = vcmask 60416  }
  0xc2   : > { %v340_v14 = vrot.slane %v338_v4, 7  ;;  %v347_v15 = vrot.slane %v345_v7, 7  ;;  %v269_v21 = vld [vmem:[%s3794_s30 + $0x2c] sm:$0xf]  ;;  %v270_v27 = vld [vmem:[%s3794_s30 + $0x30] sm:$0xf] }
  0xc3   : > { %v3350_v10 = vld [vmem:[#allocation2 + $0xdc] sm:$0xff]   ;;  %v751_v11 = vsel %vm3894_vm4, %v679_v0, %v750_v54  ;;  %v754_v12 = vsel %vm3894_vm4, %v688_v1, %v753_v55  ;;  %v336_v13 = vor.u32 %v334_v60, %v333_v2  ;;  %v352_v51 = vshrl.u32 %v269_v21, 16  ;;  %v439_v29 = vld [vmem:[#allocation2 + $0x38] sm:$0xf]  ;;  %v271_v46 = vld [vmem:[%s3794_s30 + $0x34] sm:$0xf] }
  0xc4   : > { %752 = vst [vmem:[#allocation2 + $0xe4] sm:$0xf] %v751_v11  ;;  %755 = vst [vmem:[#allocation2 + $0xe8] sm:$0xf] %v754_v12  ;;  %3041 = vmatprep.mubr.msk.bf16.mxu0 %vm846_vm3, %v3350_v10  ;;  %v343_v19 = vor.u32 %v341_v6, %v340_v14  ;;  %v350_v20 = vor.u32 %v348_v8, %v347_v15  ;;  %v355_v23 = vshll.u32 %v269_v21, 16  ;;  %v359_v24 = vshrl.u32 %v270_v27, 16 }
  0xc5   : > { %v3351_v17 = vld [vmem:[#allocation2 + $0x18] sm:$0xff]   ;;  %v431_v18 = vsel %vm3952_vm6, %v336_v13, %v430_v3  ;;  %v362_v28 = vshll.u32 %v270_v27, 16  ;;  %v354_v30 = vrot.slane %v352_v51, 7  ;;  %v272_v32 = vld [vmem:[%s3794_s30 + $0x38] sm:$0xf]  ;;  %v366_v34 = vshrl.u32 %v271_v46, 16 }
  0xc6   : > { %432 = vst [vmem:[#allocation2 + $0x2c] sm:$0xf] %v431_v18  ;;  %2962 = vmatmul.mubr.msk.bf16.gmra.mrb[4].mxu1 %vm846_vm3, %v3351_v17  ;;  %v434_v22 = vsel %vm3952_vm6, %v343_v19, %v433_v9  ;;  %v437_v26 = vsel %vm3952_vm6, %v350_v20, %v436_v16  ;;  %v361_v31 = vrot.slane %v359_v24, 7  ;;  %v442_v33 = vld [vmem:[#allocation2 + $0x3c] sm:$0xf]  ;;  %v369_v35 = vshll.u32 %v271_v46, 16 }
  0xc7   : > { %435 = vst [vmem:[#allocation2 + $0x30] sm:$0xf] %v434_v22  ;;  %438 = vst [vmem:[#allocation2 + $0x34] sm:$0xf] %v437_v26  ;;  %v373_v36 = vshrl.u32 %v272_v32, 16  ;;  %v376_v37 = vshll.u32 %v272_v32, 16  ;;  %v357_v39 = vor.u32 %v355_v23, %v354_v30 }
  0xc8   : > { %v364_v40 = vor.u32 %v362_v28, %v361_v31  ;;  %v445_v41 = vld [vmem:[#allocation2 + $0x40] sm:$0xf]  ;;  %v368_v42 = vrot.slane %v366_v34, 7  ;;  %v448_v44 = vld [vmem:[#allocation2 + $0x44] sm:$0xf]  ;;  %v3356_v57 = vld [vmem:[#allocation2 + $0x10] sm:$0xff]  }
  0xc9   : > { %v375_v43 = vrot.slane %v373_v36, 7  ;;  %v265_v45 = vld [vmem:[%s3794_s30 + $0x1c] sm:$0xf]  ;;  %v440_v48 = vsel %vm3952_vm6, %v357_v39, %v439_v29  ;;  %v427_v56 = vld [vmem:[#allocation2 + $0x20] sm:$0xf]  ;;  %v2199_v0 = vsel %vm871_vm1, %v4014_v61, 0 }
  0xca   : > { %v443_v49 = vsel %vm3952_vm6, %v364_v40, %v442_v33  ;;  %v324_v52 = vshrl.u32 %v265_v45, 16  ;;  %v327_v53 = vshll.u32 %v265_v45, 16  ;;  %441 = vst [vmem:[#allocation2 + $0x38] sm:$0xf] %v440_v48  ;;  %v371_v54 = vor.u32 %v369_v35, %v368_v42  ;;  %v762_v63 = vld [vmem:[#allocation6 + $0x6] sm:$0x3] }
  0xcb   : > { %v3352_v38 = vld [vmem:[#allocation2 + $0xe4] sm:$0xff]   ;;  %444 = vst [vmem:[#allocation2 + $0x3c] sm:$0xf] %v443_v49  ;;  %v378_v55 = vor.u32 %v376_v37, %v375_v43  ;;  %v3358_v1 = vld [vmem:[#allocation2 + $0x18] sm:$0xff]   ;;  %3232 = vmatprep.subr.msk.bf16.mxu1 %vm871_vm1, %v762_v63  ;;  %v273_v4 = vld [vmem:[%s3794_s30 + $0x3c] sm:$0xf] }
  0xcc   : > { %3042 = vmatmul.mubr.msk.bf16.gmra.mrb[12].mxu0 %vm846_vm3, %v3352_v38  ;;  %v326_v58 = vrot.slane %v324_v52, 7  ;;  %v446_v60 = vsel %vm3952_vm6, %v371_v54, %v445_v41  ;;  %v380_v7 = vshrl.u32 %v273_v4, 16  ;;  %v383_v61 = vshll.u32 %v273_v4, 16  ;;  %v451_v8 = vld [vmem:[#allocation2 + $0x48] sm:$0xf]  ;;  %v3361_v9 = vld [vmem:[#allocation2 + $0xa0] sm:$0xff]  }
  0xcd   : > { %v3353_v47 = vld [vmem:[#allocation2 + $0x28] sm:$0xff]   ;;  %3047 = vmatprep.mubr.msk.bf16.mxu0 %vm846_vm3, %v3354_v25  ;;  %v449_v62 = vsel %vm3952_vm6, %v378_v55, %v448_v44  ;;  %447 = vst [vmem:[#allocation2 + $0x40] sm:$0xf] %v446_v60  ;;  %v772_v14 = vld [vmem:[#allocation6 + $0x10] sm:$0x3]  ;;  %v1413_v16 = vsel %vm871_vm1, %v762_v63, 0 }
  0xce   : > { %2965 = vmatprep.mubr.msk.bf16.mxu1 %vm846_vm3, %v3353_v47  ;;  %v3355_v59 = vld [vmem:[#allocation2 + $0x30] sm:$0xff]   ;;  %450 = vst [vmem:[#allocation2 + $0x44] sm:$0xf] %v449_v62  ;;  %v329_v2 = vor.u32 %v327_v53, %v326_v58  ;;  %v382_v10 = vrot.slane %v380_v7, 7  ;;  %v3363_v18 = vld [vmem:[#allocation2 + $0xa8] sm:$0xff]   ;;  %v3370_v24 = vld [vmem:[#allocation2 + $0x58] sm:$0xff]  }
  0xcf   : > { %2966 = vmatmul.mubr.msk.bf16.gmra.mrb[8].mxu1 %vm846_vm3, %v3355_v59  ;;  %v3362_v12 = vld [vmem:[#allocation2 + $0x30] sm:$0xff]   ;;  %v3401_v27 = vld [vmem:[#allocation6 + $0x8] sm:$0x3]  ;;  %v3369_v22 = vld [vmem:[#allocation2 + $0xc8] sm:$0xff]   ;;  %v2396_v30 = vsel %vm871_vm1, %v772_v14, 0  ;;  %s3488_s9 = scalar_lea.vmem %s4164_s24, 1024 }
  0xd0   : > { %v428_v3 = vsel %vm3952_vm6, %v329_v2, %v427_v56  ;;  %v385_v13 = vor.u32 %v383_v61, %v382_v10  ;;  %v3365_v19 = vld [vmem:[#allocation2 + $0xb0] sm:$0xff]   ;;  %v490_v51 = vld [vmem:[%s3794_s30 + $0x3c] sm:$0xf]  ;;  %v3373_v26 = vld [vmem:[#allocation2 + $0xd8] sm:$0xff]   ;;  %p3489_p1 = scmp.ne.s32.totalorder %s4164_s24, %s3488_s9  ;;  %s3584_s28 = smov [#allocation9]  }
  0xd1   : > { %429 = vst [vmem:[#allocation2 + $0x20] sm:$0xf] %v428_v3  ;;  %507 = vst.msk [vmem:[#allocation2 + $0x98] sm:$0xf] %vm237_vm0, %v490_v51  ;;  %v3371_v25 = vld [vmem:[#allocation2 + $0xd0] sm:$0xff]   ;;  %v3372_v28 = vld [vmem:[#allocation2 + $0x60] sm:$0xff]  }
  0xd2   : > { %v3357_v6 = vld [vmem:[#allocation2 + $0x38] sm:$0xff]   ;;  %v452_v17 = vsel %vm3952_vm6, %v385_v13, %v451_v8  ;;  %v3374_v29 = vld [vmem:[#allocation2 + $0x68] sm:$0xff]   ;;  %v3375_v31 = vld [vmem:[#allocation2 + $0xe0] sm:$0xff]   ;;  %p3490_p2 = pnand %p3489_p1, %p3733_p8  ;;  %s3492_s5 = sshll.u32 %s3584_s28, 4  ;;  %s3493_s5 = int_to_ptr.vmem [resolvable:$false] %s3492_s5 }
  0xd3   : > { %2969 = vmatprep.mubr.msk.bf16.mxu1 %vm846_vm3, %v3357_v6  ;;  %453 = vst [vmem:[#allocation2 + $0x48] sm:$0xf] %v452_v17  ;;  %v3364_v20 = vld [vmem:[#allocation2 + $0x38] sm:$0xff]   ;;  %v3377_v46 = vld [vmem:[#allocation2 + $0x4] sm:$0xff]   ;;  %v3376_v32 = vld [vmem:[#allocation2 + $0x70] sm:$0xff]   ;;  %s3494_s6 = scalar_lea.vmem %s3493_s5, 2048  ;;  %p3495_p6 = scmp.lt.s32.totalorder %s4164_s24, %s3493_s5 }
  0xd4   : > { %3048 = vmatmul.mubr.msk.bf16.vlgmr.msra.gmra.mrb[0].mxu0 %vm846_vm3, %v3356_v57  ;;  %v3378_v33 = vld [vmem:[#allocation2 + $0x80] sm:$0xff]   ;;  %v3379_v34 = vld [vmem:[#allocation2 + $0xc] sm:$0xff]   ;;  %v3381_v35 = vld [vmem:[#allocation2 + $0x14] sm:$0xff]   ;;  %p3491_p4 = pneg %p3490_p2  ;;  %p3496_p13 = scmp.lt.s32.totalorder %s3494_s6, %s3488_s9 }
  0xd5   : > { %3064 = vmatpush3.bf16.msra.mxu0 %v2199_v0  ;;  %3051 = vmatprep.mubr.msk.bf16.mxu0 %vm846_vm3, %v3358_v1  ;;  %v3359_v11 = vld [vmem:[#allocation2 + $0x40] sm:$0xff]   ;;  %v3380_v36 = vld [vmem:[#allocation2 + $0x88] sm:$0xff]   ;;  %v3382_v37 = vld [vmem:[#allocation2 + $0x90] sm:$0xff]  }
  0xd6   : > { %3238 = vmatprep.subr.msk.bf16.mxu0 %vm871_vm1, %v772_v14  ;;  %v3366_v21 = vld [vmem:[#allocation2 + $0x40] sm:$0xff]   ;;  %v3385_v39 = vld [vmem:[#allocation2 + $0x2c] sm:$0xff]   ;;  %v3387_v42 = vld [vmem:[#allocation2 + $0x34] sm:$0xff]   ;;  %p3497_p0 = por %p3496_p13, %p3495_p6 }
  0xd7   : > { %2970 = vmatmul.mubr.msk.bf16.gmra.mrb[12].mxu1 %vm846_vm3, %v3359_v11  ;;  %v3386_v41 = vld [vmem:[#allocation2 + $0xa8] sm:$0xff]   ;;  %v3388_v43 = vld [vmem:[#allocation2 + $0xb0] sm:$0xff]   ;;  %v3390_v44 = vld [vmem:[#allocation2 + $0xb8] sm:$0xff]  }
  0xd8   : > { %v3360_v15 = vld [vmem:[#allocation2 + $0x20] sm:$0xff]   ;;  %2975 = vmatprep.mubr.msk.bf16.mxu1 %vm846_vm3, %v3361_v9  ;;  %v3384_v40 = vld [vmem:[#allocation2 + $0x98] sm:$0xff]   ;;  %v3394_v49 = vld [vmem:[#allocation2 + $0xd0] sm:$0xff]   ;;  %p3498_p5 = pnand %p3497_p0, %p3491_p4 }
  0xd9   : > { %v3383_v38 = vld [vmem:[#allocation2 + $0x1c] sm:$0xff]   ;;  %v3395_v52 = vld [vmem:[#allocation2 + $0x84] sm:$0xff]   ;;  %v3397_v53 = vld [vmem:[#allocation2 + $0x8c] sm:$0xff]  }
  0xda   : > { %v3368_v23 = vld [vmem:[#allocation2 + $0x48] sm:$0xff]   ;;  %v3393_v47 = vld [vmem:[#allocation2 + $0x7c] sm:$0xff]   ;;  %v3399_v56 = vld [vmem:[#allocation2 + $0x94] sm:$0xff]  }
  0xdb   : > { %v3391_v45 = vld [vmem:[#allocation2 + $0x44] sm:$0xff]   ;;  %v3396_v54 = vld [vmem:[#allocation2 + $0xd8] sm:$0xff]   ;;  %v4109_v3 = vld [vmem:[#allocation8] ss:$0 sm:$0xff] }
  0xdc   : > { %3052 = vmatmul.mubr.msk.bf16.gmra.mrb[4].mxu0 %vm846_vm3, %v3360_v15  ;;  %v3392_v48 = vld [vmem:[#allocation2 + $0xc0] sm:$0xff]   ;;  %v3400_v57 = vld [vmem:[#allocation2 + $0xe8] sm:$0xff]  }
  0xdd   : > { %3055 = vmatprep.mubr.msk.bf16.mxu0 %vm846_vm3, %v3362_v12  ;;  %v3398_v55 = vld [vmem:[#allocation2 + $0xe0] sm:$0xff]  }
  0xdf   : > { %2976 = vmatmul.mubr.msk.bf16.vlgmr.msra.gmra.mrb[0].mxu1 %vm846_vm3, %v3363_v18 }
  0xe0   : > { %2992 = vmatpush3.bf16.msra.mxu1 %v1413_v16  ;;  %2979 = vmatprep.mubr.msk.bf16.mxu1 %vm846_vm3, %v3365_v19 }
  0xe1   : > { %3234 = vmatprep.subr.msk.bf16.mxu1 %vm871_vm1, %v3401_v27 }
  0xe4   : > { %3056 = vmatmul.mubr.msk.bf16.gmra.mrb[8].mxu0 %vm846_vm3, %v3364_v20 }
  0xe5   : > { %3059 = vmatprep.mubr.msk.bf16.mxu0 %vm846_vm3, %v3366_v21 }
  0xe7   : > { %2980 = vmatmul.mubr.msk.bf16.gmra.mrb[4].mxu1 %vm846_vm3, %v3367_v50 }
  0xe8   : > { %2983 = vmatprep.mubr.msk.bf16.mxu1 %vm846_vm3, %v3369_v22 }
  0xec   : > { %3060 = vmatmul.mubr.msk.bf16.gmra.mrb[12].mxu0 %vm846_vm3, %v3368_v23 }
  0xed   : > { %3065 = vmatprep.mubr.msk.bf16.mxu0 %vm846_vm3, %v3370_v24 }
  0xef   : > { %2984 = vmatmul.mubr.msk.bf16.gmra.mrb[8].mxu1 %vm846_vm3, %v3371_v25 }
  0xf0   : > { %2987 = vmatprep.mubr.msk.bf16.mxu1 %vm846_vm3, %v3373_v26 }
  0xf4   : > { %3066 = vmatmul.mubr.msk.bf16.vlgmr.msra.gmra.mrb[0].mxu0 %vm846_vm3, %v3372_v28 }
  0xf5   : > { %3082 = vmatpush3.bf16.msra.mxu0 %v2396_v30  ;;  %3069 = vmatprep.mubr.msk.bf16.mxu0 %vm846_vm3, %v3374_v29 }
  0xf7   : > { %2988 = vmatmul.mubr.msk.bf16.gmra.mrb[12].mxu1 %vm846_vm3, %v3375_v31 }
  0xf8   : > { %2993 = vmatprep.mubr.msk.bf16.mxu1 %vm846_vm3, %v3377_v46 }
  0xfc   : > { %3070 = vmatmul.mubr.msk.bf16.gmra.mrb[4].mxu0 %vm846_vm3, %v3376_v32 }
  0xfd   : > { %3073 = vmatprep.mubr.msk.bf16.mxu0 %vm846_vm3, %v3378_v33 }
  0xff   : > { %2994 = vmatmul.mubr.msk.bf16.vlgmr.msra.gmra.mrb[0].mxu1 %vm846_vm3, %v3379_v34 }
 0x100   : > { %3100 = vmatpush3.bf16.msra.mxu1 %v3869_v5  ;;  %2997 = vmatprep.mubr.msk.bf16.mxu1 %vm846_vm3, %v3381_v35  ;;  %v3389_v5 = vld [vmem:[#allocation2 + $0x3c] sm:$0xff]  }
 0x104   : > { %3074 = vmatmul.mubr.msk.bf16.gmra.mrb[8].mxu0 %vm846_vm3, %v3380_v36 }
 0x105   : > { %3077 = vmatprep.mubr.msk.bf16.mxu0 %vm846_vm3, %v3382_v37 }
 0x107   : > { %2998 = vmatmul.mubr.msk.bf16.gmra.mrb[4].mxu1 %vm846_vm3, %v3383_v38 }
 0x108   : > { %3001 = vmatprep.mubr.msk.bf16.mxu1 %vm846_vm3, %v3385_v39 }
 0x10c   : > { %3078 = vmatmul.mubr.msk.bf16.gmra.mrb[12].mxu0 %vm846_vm3, %v3384_v40 }
 0x10d   : > { %3083 = vmatprep.mubr.msk.bf16.mxu0 %vm846_vm3, %v3386_v41 }
 0x10f   : > { %3002 = vmatmul.mubr.msk.bf16.gmra.mrb[8].mxu1 %vm846_vm3, %v3387_v42 }
 0x110   : > { %3005 = vmatprep.mubr.msk.bf16.mxu1 %vm846_vm3, %v3389_v5 }
 0x114   : > { %3084 = vmatmul.mubr.msk.bf16.vlgmr.msra.gmra.mrb[0].mxu0 %vm846_vm3, %v3388_v43 }
 0x115   : > { %3087 = vmatprep.mubr.msk.bf16.mxu0 %vm846_vm3, %v3390_v44 }
 0x117   : > { %3006 = vmatmul.mubr.msk.bf16.gmra.mrb[12].mxu1 %vm846_vm3, %v3391_v45 }
 0x118   : > { %3019 = vmatprep.mubr.msk.bf16.mxu1 %vm846_vm3, %v3393_v47 }
 0x11c   : > { %3088 = vmatmul.mubr.msk.bf16.gmra.mrb[4].mxu0 %vm846_vm3, %v3392_v48 }
 0x11d   : > { %3091 = vmatprep.mubr.msk.bf16.mxu0 %vm846_vm3, %v3394_v49 }
 0x11f   : > { %3020 = vmatmul.mubr.msk.bf16.vlgmr.msra.gmra.mrb[8].mxu1 %vm846_vm3, %v3395_v52 }
 0x120   : > { %3023 = vmatprep.mubr.msk.bf16.mxu1 %vm846_vm3, %v3397_v53 }
 0x124   : > { %3092 = vmatmul.mubr.msk.bf16.gmra.mrb[8].mxu0 %vm846_vm3, %v3396_v54 }
 0x125   : > { %3095 = vmatprep.mubr.msk.bf16.mxu0 %vm846_vm3, %v3398_v55 }
 0x127   : > { %3024 = vmatmul.mubr.msk.bf16.gmra.mrb[12].mxu1 %vm846_vm3, %v3399_v56 }
 0x12c   : > { %3096 = vmatmul.mubr.msk.bf16.gmra.mrb[12].mxu0 %vm846_vm3, %v3400_v57 }
 0x1d2   : > { %v2995_v58 = vpop.f32.mrb[0].mxu1 }
 0x1d3   : > { %v1449_v59 = vpop.f32.mrb[1].mxu1 }
 0x1d4   : > { %v2996_v60 = vpop.f32.mrb[2].mxu1 }
 0x1d5   : > { %v1452_v62 = vpop.f32.mrb[3].mxu1 }
 0x1da   : > { %v2999_v63 = vpop.f32.mrb[4].mxu1 }
 0x1db   : > { %v1465_v0 = vpop.f32.mrb[5].mxu1 }
 0x1dc   : > { %v3000_v1 = vpop.f32.mrb[6].mxu1 }
 0x1dd   : > { %v1468_v2 = vpop.f32.mrb[7].mxu1 }
 0x1e7   : > { %v3085_v4 = vpop.f32.mrb[0].mxu0 }
 0x1e8   : > { %v3101_v6 = vadd.f32 %v3085_v4, %v2995_v58  ;;  %v2432_v7 = vpop.f32.mrb[1].mxu0 }
 0x1e9   : > { %v3102_v61 = vadd.f32 %v2432_v7, %v1449_v59  ;;  %v3086_v8 = vpop.f32.mrb[2].mxu0 }
 0x1ea   : > { %v2519_v9 = vadd.f32 %v3101_v6, %v4109_v3  ;;  %v3103_v10 = vadd.f32 %v3086_v8, %v2996_v60  ;;  %v2435_v11 = vpop.f32.mrb[3].mxu0 }
 0x1eb   : > { %v2517_v12 = vadd.f32 %v3102_v61, %v4109_v3  ;;  %v3104_v13 = vadd.f32 %v2435_v11, %v1452_v62 }
 0x1ec   : > { %v2535_v14 = vpack.c.bf16 %v2519_v9, %v2519_v9  ;;  %v2520_v15 = vadd.f32 %v3103_v10, %v4109_v3 }
 0x1ed   : > { %v2533_v16 = vpack.c.bf16 %v2517_v12, %v2517_v12  ;;  %v2518_v17 = vadd.f32 %v3104_v13, %v4109_v3 }
 0x1ee   : > { %2552 = vst.msk [vmem:[%s4117_s20 + $0x8] sm:$0xf] %vm2549_vm7, %v2535_v14  ;;  %v2536_v18 = vpack.c.bf16 %v2520_v15, %v2520_v15 }
 0x1ef   : > { %2550 = vst.msk [vmem:[%s4117_s20] sm:$0xf] %vm2549_vm7, %v2533_v16  ;;  %v2534_v19 = vpack.c.bf16 %v2518_v17, %v2518_v17  ;;  %v3089_v20 = vpop.f32.mrb[4].mxu0 }
 0x1f0   : > { %2553 = vst.msk [vmem:[%s4117_s20 + $0xc] sm:$0xf] %vm2549_vm7, %v2536_v18  ;;  %v3105_v21 = vadd.f32 %v3089_v20, %v2999_v63  ;;  %v2448_v27 = vpop.f32.mrb[5].mxu0 }
 0x1f1   : > { %2551 = vst.msk [vmem:[%s4117_s20 + $0x4] sm:$0xf] %vm2549_vm7, %v2534_v19  ;;  %v3106_v50 = vadd.f32 %v2448_v27, %v1465_v0  ;;  %v3090_v22 = vpop.f32.mrb[6].mxu0 }
 0x1f2   : > { %v2523_v51 = vadd.f32 %v3105_v21, %v4109_v3  ;;  %v3107_v23 = vadd.f32 %v3090_v22, %v3000_v1  ;;  %v2451_v24 = vpop.f32.mrb[7].mxu0  ;;  %v3021_v30 = vpop.f32.mrb[8].mxu1 }
 0x1f3   : > { %v2521_v25 = vadd.f32 %v3106_v50, %v4109_v3  ;;  %v3108_v26 = vadd.f32 %v2451_v24, %v1468_v2  ;;  %v1677_v32 = vpop.f32.mrb[9].mxu1 }
 0x1f4   : > { %v2539_v28 = vpack.c.bf16 %v2523_v51, %v2523_v51  ;;  %v2524_v29 = vadd.f32 %v3107_v23, %v4109_v3  ;;  %v3022_v34 = vpop.f32.mrb[10].mxu1 }
 0x1f5   : > { %v2537_v31 = vpack.c.bf16 %v2521_v25, %v2521_v25  ;;  %v2522_v46 = vadd.f32 %v3108_v26, %v4109_v3  ;;  %v1680_v37 = vpop.f32.mrb[11].mxu1 }
 0x1f6   : > { %2556 = vst.msk [vmem:[%s4117_s20 + $0x18] sm:$0xf] %vm2549_vm7, %v2539_v28  ;;  %v2540_v33 = vpack.c.bf16 %v2524_v29, %v2524_v29 }
 0x1f7   : > { %2554 = vst.msk [vmem:[%s4117_s20 + $0x10] sm:$0xf] %vm2549_vm7, %v2537_v31  ;;  %v2538_v35 = vpack.c.bf16 %v2522_v46, %v2522_v46  ;;  %v3093_v36 = vpop.f32.mrb[8].mxu0 }
 0x1f8   : > { %2557 = vst.msk [vmem:[%s4117_s20 + $0x1c] sm:$0xf] %vm2549_vm7, %v2540_v33  ;;  %v3109_v38 = vadd.f32 %v3093_v36, %v3021_v30  ;;  %v2464_v39 = vpop.f32.mrb[9].mxu0 }
 0x1f9   : > { %2555 = vst.msk [vmem:[%s4117_s20 + $0x14] sm:$0xf] %vm2549_vm7, %v2538_v35  ;;  %v3110_v40 = vadd.f32 %v2464_v39, %v1677_v32  ;;  %v3094_v41 = vpop.f32.mrb[10].mxu0 }
 0x1fa   : > { %v2527_v42 = vadd.f32 %v3109_v38, %v4109_v3  ;;  %v3111_v5 = vadd.f32 %v3094_v41, %v3022_v34  ;;  %v2467_v43 = vpop.f32.mrb[11].mxu0  ;;  %v3025_v49 = vpop.f32.mrb[12].mxu1 }
 0x1fb   : > { %v2525_v44 = vadd.f32 %v3110_v40, %v4109_v3  ;;  %v3112_v45 = vadd.f32 %v2467_v43, %v1680_v37  ;;  %v1693_v54 = vpop.f32.mrb[13].mxu1 }
 0x1fc   : > { %v2543_v47 = vpack.c.bf16 %v2527_v42, %v2527_v42  ;;  %v2528_v48 = vadd.f32 %v3111_v5, %v4109_v3  ;;  %v3026_v56 = vpop.f32.mrb[14].mxu1 }
 0x1fd   : > { %v2541_v52 = vpack.c.bf16 %v2525_v44, %v2525_v44  ;;  %v2526_v53 = vadd.f32 %v3112_v45, %v4109_v3  ;;  %v1696_v59 = vpop.f32.mrb[15].mxu1 }
 0x1fe   : > { %2560 = vst.msk [vmem:[%s4117_s20 + $0x28] sm:$0xf] %vm2549_vm7, %v2543_v47  ;;  %v2544_v55 = vpack.c.bf16 %v2528_v48, %v2528_v48 }
 0x1ff   : > { %2558 = vst.msk [vmem:[%s4117_s20 + $0x20] sm:$0xf] %vm2549_vm7, %v2541_v52  ;;  %v2542_v57 = vpack.c.bf16 %v2526_v53, %v2526_v53  ;;  %v3097_v58 = vpop.f32.mrb[12].mxu0 }
 0x200   : > { %2561 = vst.msk [vmem:[%s4117_s20 + $0x2c] sm:$0xf] %vm2549_vm7, %v2544_v55  ;;  %v3113_v60 = vadd.f32 %v3097_v58, %v3025_v49  ;;  %v2480_v62 = vpop.f32.mrb[13].mxu0 }
 0x201   : > { %2559 = vst.msk [vmem:[%s4117_s20 + $0x24] sm:$0xf] %vm2549_vm7, %v2542_v57  ;;  %v3114_v63 = vadd.f32 %v2480_v62, %v1693_v54  ;;  %v3098_v0 = vpop.f32.mrb[14].mxu0 }
 0x202   : > { %v2531_v1 = vadd.f32 %v3113_v60, %v4109_v3  ;;  %v3115_v2 = vadd.f32 %v3098_v0, %v3026_v56  ;;  %v2483_v4 = vpop.f32.mrb[15].mxu0 }
 0x203   : > { %v2529_v6 = vadd.f32 %v3114_v63, %v4109_v3  ;;  %v3116_v7 = vadd.f32 %v2483_v4, %v1696_v59 }
 0x204   : > { %v2547_v61 = vpack.c.bf16 %v2531_v1, %v2531_v1  ;;  %v2532_v8 = vadd.f32 %v3115_v2, %v4109_v3 }
 0x205   : > { %v2545_v9 = vpack.c.bf16 %v2529_v6, %v2529_v6  ;;  %v2530_v10 = vadd.f32 %v3116_v7, %v4109_v3 }
 0x206   : > { %2564 = vst.msk [vmem:[%s4117_s20 + $0x38] sm:$0xf] %vm2549_vm7, %v2547_v61  ;;  %v2548_v11 = vpack.c.bf16 %v2532_v8, %v2532_v8 }
 0x207   : > { %2562 = vst.msk [vmem:[%s4117_s20 + $0x30] sm:$0xf] %vm2549_vm7, %v2545_v9  ;;  %v2546_v12 = vpack.c.bf16 %v2530_v10, %v2530_v10 }
 0x208   : > { %2565 = vst.msk [vmem:[%s4117_s20 + $0x3c] sm:$0xf] %vm2549_vm7, %v2548_v11 }
 0x209   : > { %2563 = vst.msk [vmem:[%s4117_s20 + $0x34] sm:$0xf] %vm2549_vm7, %v2546_v12 }
 0x20a   : > { %3501 = shalt.err (!%p3498_p5)
}
 0x20b   : > { %s3502_s21 = scalar_lea.hbm %s4162_s26, 1024  ;;  %s3506_s25 = scalar_lea.hbm %s4221_s3, 4096 }
 0x20c   : > { %p3503_p9 = scmp.ne.s32.totalorder %s4162_s26, %s3502_s21  ;;  %p3507_p3 = scmp.lt.u32.totalorder %s4162_s26, %s4221_s3 }
 0x20d   : > { %p3508_p7 = scmp.lt.u32.totalorder %s3506_s25, %s3502_s21  ;;  %p3510_p1 = scmp.lt.u32.totalorder %s3502_s21, %s4162_s26 }
 0x20e   : > { %p3504_p12 = pnand %p3503_p9, %p3733_p8 }
 0x20f   : > { %p3509_p10 = por %p3508_p7, %p3507_p3 }
 0x210   : > { %p3505_p11 = pneg %p3504_p12 }
 0x211   : > { %p3511_p2 = por %p3510_p1, %p3509_p10 }
 0x213   : > { %p3512_p4 = pnand %p3511_p2, %p3505_p11 }
 0x215   : > { %3515 = shalt.err (!%p3512_p4)
}
 0x216   : > { %s3585_s20 = smov 64   ;;  %s3586_s22 = smov 4  }
 0x217   : > { %3249 = dma.vmem_to_hbm [thread:$0]  (%p3733_p8), %s4164_s24, 1024, %s4162_s26, %s2567_s15, %s3585_s20, %s3585_s20, %s3586_s22  }
 0x218 PF: > { %p3271_p6 = scmp.ge.s32.totalorder %s3574_s17, 2  ;;  %s2597_s7 = sand.u32 1, %s3554_s12  }
 0x219   : > { %p4242_p13 = scmp.ne.s32.totalorder %s4229_s23, 0  ;;  %s2598_s8 = scalar_lea.sflag [#allocation5], %s2597_s7 }
 0x21b   : > { %p3263_p0 = pnand %p3271_p6, %p4242_p13 }
 0x21d   : > { %3549 = dma.done.wait (!%p3263_p0), %s2598_s8, 1024  }
 0x21e   : > { %3551 = vsyncadd (!%p3263_p0), %s2598_s8, 4294966272  ;;  %s20_s17 = sadd.s32 1, %s3574_s17   ;;  %s4243_s12 = smov %s3558_s13 }
 0x21f   : > { %p17_p5 = scmp.ge.s32.totalorder %s20_s17, 6   ;;  %s4244_s13 = smov %s3562_s14 }
 0x220   : > { %s4245_s14 = smov %s3742_s4  ;;  %s4246_s15 = smov %s3570_s16 }
 0x221   : > { %s4247_s16 = smov %s4249_s18  ;;  %19 = sbr.rel (!%p17_p5) target bundleno = 7 (0x7), region = 101 }
 0x228   :  { %2603 = vsyncpa [#allocation4], 1 }
 0x229   :  { %2605 = vsyncpa [#allocation4 + $0x1], 1 }
 0x22a   :  { %2606 = vsyncpa [#allocation7], 1 }
 0x22b   :  { %2607 = vsyncpa [#allocation5], 1 }
 0x22c   :  { %2609 = vsyncpa [#allocation5 + $0x1], 1 }

</bundles_post_ra>
